<compile_context>
chip_gen: v7x
topology: tpu7x:2x2x1
jax: 0.10.0
libtpu: 0.0.40
codegen_flags: <defaults>
</compile_context>

<pallas_src>
from functools import partial

import jax
import jax.numpy as jnp
from jax.experimental import pallas as pl
from jax.experimental.pallas import tpu as pltpu

EPS = 1e-5          # InstanceNorm eps
NEG_SLOPE = 0.01    # nn.LeakyReLU default negative_slope


# ---------------------------------------------------------------------------
# in-kernel helpers (traced inside the Pallas kernel body)
# ---------------------------------------------------------------------------
def _instance_norm(y, gamma, beta, B, HW):
    """Per-image InstanceNorm with a fused scale/shift epilogue.

    y: (C, B*HW) -- B images concatenated on the lane axis.
    gamma/beta: (C, 1).
    Stats via two independent lane reduces; var = E[y^2] - E[y]^2.
    """
    inv = jnp.float32(1.0 / HW)
    parts = []
    for b in range(B):                               # static (B is 1 or N)
        yb = y[:, b * HW:(b + 1) * HW]
        mean = jnp.sum(yb, axis=1, keepdims=True) * inv
        ex2 = jnp.sum(yb * yb, axis=1, keepdims=True) * inv
        var = ex2 - mean * mean
        scale = gamma * jax.lax.rsqrt(var + EPS)     # tiny (C,1) math
        shift = beta - mean * scale
        parts.append(yb * scale + shift)             # one full-width pass
    return parts[0] if B == 1 else jnp.concatenate(parts, axis=1)


def _leaky_relu(y):
    # max(y, a*y) == LeakyReLU(y) for 0 < a < 1
    return jnp.maximum(y, NEG_SLOPE * y)


# ---------------------------------------------------------------------------
# fused Pallas kernel: one grid step handles B images laid out as (C, B*HW)
# ---------------------------------------------------------------------------
def bottleneck_kernel(x_ref, w1sk_ref, w2_ref, w3_ref, mask_ref, np_ref, o_ref,
                      *, B, H, W, Cb, Cout):
    HW = H * W
    lanes = B * HW
    x = x_ref[...]                                   # (Cin, B*HW) lane axis = spatial
    nprm = np_ref[...]                               # (Cmax, 8) [g1 b1 g2 b2 g3 b3 gsk bsk]

    # ---- conv1 + skip: fused 1x1 matmul over shared RHS x -----------------
    y1sk = jnp.dot(w1sk_ref[...], x, preferred_element_type=jnp.float32)   # (Cb+Cout, lanes)
    y1 = _leaky_relu(_instance_norm(y1sk[:Cb], nprm[:Cb, 0:1], nprm[:Cb, 1:2], B, HW))
    sk = _instance_norm(y1sk[Cb:Cb + Cout], nprm[:Cout, 6:7], nprm[:Cout, 7:8], B, HW)

    # ---- conv2: 3x3 "same" (Cb -> Cb) via lane-rolled im2col ---------------
    # Boundary (and cross-image) handling uses the precomputed {0,1} masks.
    taps = []
    t = 0
    for dy in (-1, 0, 1):
        for dx in (-1, 0, 1):
            if dy == 0 and dx == 0:
                taps.append(y1)                      # center tap: no shift / mask
                continue
            d = dy * W + dx                          # flat spatial shift
            shifted = pltpu.roll(y1, shift=(-d) % lanes, axis=1)   # shifted[i] = y1[i+d]
            taps.append(shifted * mask_ref[t:t + 1, :])
            t += 1
    # Each tap is exactly Cb=8 sublanes -> the concat is vreg-aligned and can
    # stay register/VMEM resident; contracted with one K = 9*Cb matmul.
    patches = jnp.concatenate(taps, axis=0)                                  # (9*Cb, lanes)
    y2 = jnp.dot(w2_ref[...], patches, preferred_element_type=jnp.float32)   # (Cb, lanes)
    y2 = _leaky_relu(_instance_norm(y2, nprm[:Cb, 2:3], nprm[:Cb, 3:4], B, HW))

    # ---- conv3: 1x1 (Cb -> Cout) -> InstanceNorm (no nonlin) ---------------
    y3 = jnp.dot(w3_ref[...], y2, preferred_element_type=jnp.float32)        # (Cout, lanes)
    y3 = _instance_norm(y3, nprm[:Cout, 4:5], nprm[:Cout, 5:6], B, HW)

    # ---- out += residual ; nonlin3 ------------------------------------------
    o_ref[...] = _leaky_relu(y3 + sk)                # lane-dense (Cout, >=256) store


# ---------------------------------------------------------------------------
# wrapper helpers
# ---------------------------------------------------------------------------
def _make_tap_masks(H, W):
    """(8, H*W) f32 {0,1} validity masks for the 8 off-center 3x3 taps."""
    HW = H * W
    idx = jnp.arange(HW, dtype=jnp.int32)
    row = idx // W
    col = idx % W
    masks = []
    for dy in (-1, 0, 1):
        for dx in (-1, 0, 1):
            if dy == 0 and dx == 0:
                continue
            ok = (row + dy >= 0) & (row + dy < H) & (col + dx >= 0) & (col + dx < W)
            masks.append(ok.astype(jnp.float32))
    return jnp.stack(masks, axis=0)


def _has_two_tensorcores():
    """True on dual-TC chips (v7x); falls back to single-TC behavior."""
    try:
        kind = jax.devices()[0].device_kind.lower().replace(" ", "")
    except Exception:
        return False
    return ("v7" in kind) or ("tpu7" in kind)


# ---------------------------------------------------------------------------
# wrapper
# ---------------------------------------------------------------------------
def bottleneck_forward(x_nchw, params, *, Cb, Cout):
    N, Cin, H, W = x_nchw.shape
    HW = H * W
    Cmax = params["normparams"].shape[0]
    x = x_nchw.reshape(N, Cin, HW).astype(jnp.float32)   # NCHW -> (N, C, H*W), free reshape

    # Dual-TC chips: one image per grid step (parallel over TensorCores).
    # Single-TC chips: collapse both images into one lane-batched grid step.
    B = 1 if _has_two_tensorcores() else N
    grid = (N // B,)

    mask = jnp.tile(_make_tap_masks(H, W), (1, B))                        # (8, B*HW)
    w1sk = jnp.concatenate([params["w1"], params["wsk"]], axis=0)          # (Cb+Cout, Cin)

    kernel = partial(bottleneck_kernel, B=B, H=H, W=W, Cb=Cb, Cout=Cout)
    weight_specs = [
        pl.BlockSpec((Cb + Cout, Cin), lambda b: (0, 0)),   # stacked conv1 + skip weights
        pl.BlockSpec((Cb, 9 * Cb), lambda b: (0, 0)),       # w2 (im2col layout)
        pl.BlockSpec((Cout, Cb), lambda b: (0, 0)),         # w3
        pl.BlockSpec((8, B * HW), lambda b: (0, 0)),        # hoisted boundary masks
        pl.BlockSpec((Cmax, 8), lambda b: (0, 0)),          # packed norm affine params
    ]
    operands = (w1sk, params["w2"], params["w3"], mask, params["normparams"])

    if B == 1:
        # grid=(N,), one image per step, parallel across TensorCores (v7x).
        out = pl.pallas_call(
            kernel,
            out_shape=jax.ShapeDtypeStruct((N, Cout, HW), jnp.float32),
            grid=grid,
            in_specs=[pl.BlockSpec((None, Cin, HW), lambda b: (b, 0, 0))] + weight_specs,
            out_specs=pl.BlockSpec((None, Cout, HW), lambda b: (b, 0, 0)),
            compiler_params=pltpu.CompilerParams(dimension_semantics=("parallel",)),
        )(x, *operands)
        return out.reshape(N, Cout, H, W)

    # Single-TC path: all images share one step; x laid out as (Cin, N*HW).
    x_cb = x.transpose(1, 0, 2).reshape(Cin, N * HW)       # tiny layout plumbing (8 KiB)
    out = pl.pallas_call(
        kernel,
        out_shape=jax.ShapeDtypeStruct((Cout, N * HW), jnp.float32),
        grid=grid,
        in_specs=[pl.BlockSpec((Cin, N * HW), lambda b: (0, 0))] + weight_specs,
        out_specs=pl.BlockSpec((Cout, N * HW), lambda b: (0, 0)),
        compiler_params=pltpu.CompilerParams(dimension_semantics=("arbitrary",)),
    )(x_cb, *operands)
    return out.reshape(Cout, N, H, W).transpose(1, 0, 2, 3)


# ---------------------------------------------------------------------------
# pure-JAX reference (for correctness check)
# ---------------------------------------------------------------------------
def bottleneck_reference(x_nchw, params, *, Cb, Cout):
    x = x_nchw.astype(jnp.float32)
    dn = ("NCHW", "OIHW", "NCHW")
    npm = params["normparams"]
    g1, b1 = npm[:Cb, 0], npm[:Cb, 1]
    g2, b2 = npm[:Cb, 2], npm[:Cb, 3]
    g3, b3 = npm[:Cout, 4], npm[:Cout, 5]
    gsk, bsk = npm[:Cout, 6], npm[:Cout, 7]

    def inorm(y, g, b):
        mean = jnp.mean(y, axis=(2, 3), keepdims=True)
        var = jnp.mean((y - mean) ** 2, axis=(2, 3), keepdims=True)
        return ((y - mean) * jax.lax.rsqrt(var + EPS) * g.reshape(1, -1, 1, 1)
                + b.reshape(1, -1, 1, 1))

    def lrelu(y):
        return jnp.where(y >= 0, y, NEG_SLOPE * y)

    w1 = params["w1"][:, :, None, None]
    y1 = jax.lax.conv_general_dilated(x, w1, (1, 1), "SAME", dimension_numbers=dn)
    y1 = lrelu(inorm(y1, g1, b1))

    # kernel stores w2 as (Cb, 9*Cb) with column index = (3*kh + kw)*Cb + cin
    w2 = params["w2"].reshape(Cb, 3, 3, Cb).transpose(0, 3, 1, 2)   # -> OIHW
    y2 = jax.lax.conv_general_dilated(y1, w2, (1, 1), "SAME", dimension_numbers=dn)
    y2 = lrelu(inorm(y2, g2, b2))

    w3 = params["w3"][:, :, None, None]
    y3 = jax.lax.conv_general_dilated(y2, w3, (1, 1), "SAME", dimension_numbers=dn)
    y3 = inorm(y3, g3, b3)

    wsk = params["wsk"][:, :, None, None]
    sk = jax.lax.conv_general_dilated(x, wsk, (1, 1), "SAME", dimension_numbers=dn)
    sk = inorm(sk, gsk, bsk)

    return lrelu(y3 + sk)


# ---------------------------------------------------------------------------
# deterministic parameter construction (synthetic weights, shapes match module)
# ---------------------------------------------------------------------------
def make_params(key, Cin, Cb, Cout):
    ks = jax.random.split(key, 6)
    Cmax = max(Cb, Cout)
    w1 = 0.2 * jax.random.normal(ks[0], (Cb, Cin), jnp.float32)        # 1x1 conv1
    w2 = 0.2 * jax.random.normal(ks[1], (Cb, 9 * Cb), jnp.float32)     # 3x3 conv2 (im2col)
    w3 = 0.2 * jax.random.normal(ks[2], (Cout, Cb), jnp.float32)       # 1x1 conv3
    wsk = 0.2 * jax.random.normal(ks[3], (Cout, Cin), jnp.float32)     # 1x1 skip projection
    gammas = 1.0 + 0.1 * jax.random.normal(ks[4], (Cmax, 4), jnp.float32)
    betas = 0.1 * jax.random.normal(ks[5], (Cmax, 4), jnp.float32)
    # packed per-channel affine params: columns [g1, b1, g2, b2, g3, b3, gsk, bsk]
    normparams = jnp.stack(
        [gammas[:, 0], betas[:, 0], gammas[:, 1], betas[:, 1],
         gammas[:, 2], betas[:, 2], gammas[:, 3], betas[:, 3]], axis=1)
    return dict(w1=w1, w2=w2, w3=w3, wsk=wsk, normparams=normparams)


if __name__ == "__main__":
    # TODO(synk): DropPath (stochastic_depth_p=0), dropout_op=None, SqueezeExcite
    # (squeeze_excitation=False) and the strided/avg-pool skip variant (stride=1
    # here) are disabled in this instantiation, matching eval-mode semantics.
    N, Cin, Cb, Cout, H, W = 2, 4, 8, 16, 16, 16
    key = jax.random.PRNGKey(0)
    kx, kp = jax.random.split(key)
    x = jax.random.normal(kx, (N, Cin, H, W), jnp.float32)   # NCHW, like PyTorch
    params = make_params(kp, Cin, Cb, Cout)

    out = jax.block_until_ready(bottleneck_forward(x, params, Cb=Cb, Cout=Cout))
    ref = jax.block_until_ready(bottleneck_reference(x, params, Cb=Cb, Cout=Cout))

    assert out.shape == (N, Cout, H, W), out.shape
    assert out.dtype == jnp.float32
    err = float(jnp.max(jnp.abs(out - ref)))
    assert err < 2e-3, f"max abs err {err}"
    print("KERNEL_OK")
</pallas_src>

<mosaic_0001>
module attributes {stable_mosaic.version = 11 : i64} {
  func.func @bottleneck_kernel(%arg0: i32, %arg1: memref<4x512xf32, #tpu.memory_space<vmem>>, %arg2: memref<24x4xf32, #tpu.memory_space<vmem>>, %arg3: memref<8x72xf32, #tpu.memory_space<vmem>>, %arg4: memref<16x8xf32, #tpu.memory_space<vmem>>, %arg5: memref<8x512xf32, #tpu.memory_space<vmem>>, %arg6: memref<16x8xf32, #tpu.memory_space<vmem>>, %arg7: memref<16x512xf32, #tpu.memory_space<vmem>>) attributes {dimension_semantics = [#tpu.dimension_semantics<arbitrary>], iteration_bounds = array<i64: 1>, scalar_prefetch = 0 : i64, scratch_operands = 0 : i64, tpu.core_type = #tpu.core_type<tc>, window_params = [{pipeline_mode = #tpu.pipeline_mode<synchronous>, transform_indices = @transform_0, window_bounds = array<i64: 4, 512>}, {pipeline_mode = #tpu.pipeline_mode<synchronous>, transform_indices = @transform_1, window_bounds = array<i64: 24, 4>}, {pipeline_mode = #tpu.pipeline_mode<synchronous>, transform_indices = @transform_2, window_bounds = array<i64: 8, 72>}, {pipeline_mode = #tpu.pipeline_mode<synchronous>, transform_indices = @transform_3, window_bounds = array<i64: 16, 8>}, {pipeline_mode = #tpu.pipeline_mode<synchronous>, transform_indices = @transform_4, window_bounds = array<i64: 8, 512>}, {pipeline_mode = #tpu.pipeline_mode<synchronous>, transform_indices = @transform_5, window_bounds = array<i64: 16, 8>}, {pipeline_mode = #tpu.pipeline_mode<synchronous>, transform_indices = @transform_6, window_bounds = array<i64: 16, 512>}]} {
    %c0 = arith.constant 0 : index
    %c0_0 = arith.constant 0 : index
    %0 = vector.load %arg1[%c0, %c0_0] : memref<4x512xf32, #tpu.memory_space<vmem>>, vector<4x512xf32>
    %c0_1 = arith.constant 0 : index
    %c0_2 = arith.constant 0 : index
    %1 = vector.load %arg6[%c0_1, %c0_2] : memref<16x8xf32, #tpu.memory_space<vmem>>, vector<16x8xf32>
    %c0_3 = arith.constant 0 : index
    %c0_4 = arith.constant 0 : index
    %2 = vector.load %arg2[%c0_3, %c0_4] : memref<24x4xf32, #tpu.memory_space<vmem>>, vector<24x4xf32>
    %cst = arith.constant dense<0.000000e+00> : vector<24x512xf32>
    %3 = tpu.matmul %2, %0, %cst {dimension_numbers = #tpu.dot_dimension_numbers<[1], [0], [0], [1], [0, 0, 1, 1], [], []>} : vector<24x4xf32>, vector<4x512xf32>, vector<24x512xf32> -> vector<24x512xf32>
    %4 = vector.extract_strided_slice %3 {offsets = [0, 0], sizes = [8, 512], strides = [1, 1]} : vector<24x512xf32> to vector<8x512xf32>
    %5 = vector.extract_strided_slice %1 {offsets = [0, 0], sizes = [8, 1], strides = [1, 1]} : vector<16x8xf32> to vector<8x1xf32>
    %6 = vector.extract_strided_slice %1 {offsets = [0, 1], sizes = [8, 1], strides = [1, 1]} : vector<16x8xf32> to vector<8x1xf32>
    %7 = vector.extract_strided_slice %4 {offsets = [0, 0], sizes = [8, 256], strides = [1, 1]} : vector<8x512xf32> to vector<8x256xf32>
    %cst_5 = arith.constant dense<0.000000e+00> : vector<8xf32>
    %8 = vector.multi_reduction <add>, %7, %cst_5 [1] : vector<8x256xf32> to vector<8xf32>
    %9 = vector.shape_cast %8 : vector<8xf32> to vector<8x1xf32>
    %cst_6 = arith.constant 3.906250e-03 : f32
    %10 = vector.broadcast %cst_6 : f32 to vector<8x1xf32>
    %11 = arith.mulf %9, %10 : vector<8x1xf32>
    %12 = arith.mulf %7, %7 : vector<8x256xf32>
    %cst_7 = arith.constant dense<0.000000e+00> : vector<8xf32>
    %13 = vector.multi_reduction <add>, %12, %cst_7 [1] : vector<8x256xf32> to vector<8xf32>
    %14 = vector.shape_cast %13 : vector<8xf32> to vector<8x1xf32>
    %cst_8 = arith.constant 3.906250e-03 : f32
    %15 = vector.broadcast %cst_8 : f32 to vector<8x1xf32>
    %16 = arith.mulf %14, %15 : vector<8x1xf32>
    %17 = arith.mulf %11, %11 : vector<8x1xf32>
    %18 = arith.subf %16, %17 : vector<8x1xf32>
    %cst_9 = arith.constant 9.99999974E-6 : f32
    %19 = vector.broadcast %cst_9 : f32 to vector<8x1xf32>
    %20 = arith.addf %18, %19 : vector<8x1xf32>
    %21 = math.rsqrt %20 : vector<8x1xf32>
    %22 = arith.mulf %5, %21 : vector<8x1xf32>
    %23 = arith.mulf %11, %22 : vector<8x1xf32>
    %24 = arith.subf %6, %23 : vector<8x1xf32>
    %25 = vector.broadcast %22 : vector<8x1xf32> to vector<8x256xf32>
    %26 = arith.mulf %7, %25 : vector<8x256xf32>
    %27 = vector.broadcast %24 : vector<8x1xf32> to vector<8x256xf32>
    %28 = arith.addf %26, %27 : vector<8x256xf32>
    %29 = vector.extract_strided_slice %4 {offsets = [0, 256], sizes = [8, 256], strides = [1, 1]} : vector<8x512xf32> to vector<8x256xf32>
    %cst_10 = arith.constant dense<0.000000e+00> : vector<8xf32>
    %30 = vector.multi_reduction <add>, %29, %cst_10 [1] : vector<8x256xf32> to vector<8xf32>
    %31 = vector.shape_cast %30 : vector<8xf32> to vector<8x1xf32>
    %cst_11 = arith.constant 3.906250e-03 : f32
    %32 = vector.broadcast %cst_11 : f32 to vector<8x1xf32>
    %33 = arith.mulf %31, %32 : vector<8x1xf32>
    %34 = arith.mulf %29, %29 : vector<8x256xf32>
    %cst_12 = arith.constant dense<0.000000e+00> : vector<8xf32>
    %35 = vector.multi_reduction <add>, %34, %cst_12 [1] : vector<8x256xf32> to vector<8xf32>
    %36 = vector.shape_cast %35 : vector<8xf32> to vector<8x1xf32>
    %cst_13 = arith.constant 3.906250e-03 : f32
    %37 = vector.broadcast %cst_13 : f32 to vector<8x1xf32>
    %38 = arith.mulf %36, %37 : vector<8x1xf32>
    %39 = arith.mulf %33, %33 : vector<8x1xf32>
    %40 = arith.subf %38, %39 : vector<8x1xf32>
    %cst_14 = arith.constant 9.99999974E-6 : f32
    %41 = vector.broadcast %cst_14 : f32 to vector<8x1xf32>
    %42 = arith.addf %40, %41 : vector<8x1xf32>
    %43 = math.rsqrt %42 : vector<8x1xf32>
    %44 = arith.mulf %5, %43 : vector<8x1xf32>
    %45 = arith.mulf %33, %44 : vector<8x1xf32>
    %46 = arith.subf %6, %45 : vector<8x1xf32>
    %47 = vector.broadcast %44 : vector<8x1xf32> to vector<8x256xf32>
    %48 = arith.mulf %29, %47 : vector<8x256xf32>
    %49 = vector.broadcast %46 : vector<8x1xf32> to vector<8x256xf32>
    %50 = arith.addf %48, %49 : vector<8x256xf32>
    %51 = tpu.concatenate %28, %50 in 1 : vector<8x256xf32>, vector<8x256xf32> -> vector<8x512xf32>
    %cst_15 = arith.constant 0.00999999977 : f32
    %52 = vector.broadcast %cst_15 : f32 to vector<8x512xf32>
    %53 = arith.mulf %52, %51 : vector<8x512xf32>
    %54 = arith.maximumf %51, %53 : vector<8x512xf32>
    %55 = vector.extract_strided_slice %3 {offsets = [8, 0], sizes = [16, 512], strides = [1, 1]} : vector<24x512xf32> to vector<16x512xf32>
    %56 = vector.extract_strided_slice %1 {offsets = [0, 6], sizes = [16, 1], strides = [1, 1]} : vector<16x8xf32> to vector<16x1xf32>
    %57 = vector.extract_strided_slice %1 {offsets = [0, 7], sizes = [16, 1], strides = [1, 1]} : vector<16x8xf32> to vector<16x1xf32>
    %58 = vector.extract_strided_slice %55 {offsets = [0, 0], sizes = [16, 256], strides = [1, 1]} : vector<16x512xf32> to vector<16x256xf32>
    %cst_16 = arith.constant dense<0.000000e+00> : vector<16xf32>
    %59 = vector.multi_reduction <add>, %58, %cst_16 [1] : vector<16x256xf32> to vector<16xf32>
    %60 = vector.shape_cast %59 : vector<16xf32> to vector<16x1xf32>
    %cst_17 = arith.constant 3.906250e-03 : f32
    %61 = vector.broadcast %cst_17 : f32 to vector<16x1xf32>
    %62 = arith.mulf %60, %61 : vector<16x1xf32>
    %63 = arith.mulf %58, %58 : vector<16x256xf32>
    %cst_18 = arith.constant dense<0.000000e+00> : vector<16xf32>
    %64 = vector.multi_reduction <add>, %63, %cst_18 [1] : vector<16x256xf32> to vector<16xf32>
    %65 = vector.shape_cast %64 : vector<16xf32> to vector<16x1xf32>
    %cst_19 = arith.constant 3.906250e-03 : f32
    %66 = vector.broadcast %cst_19 : f32 to vector<16x1xf32>
    %67 = arith.mulf %65, %66 : vector<16x1xf32>
    %68 = arith.mulf %62, %62 : vector<16x1xf32>
    %69 = arith.subf %67, %68 : vector<16x1xf32>
    %cst_20 = arith.constant 9.99999974E-6 : f32
    %70 = vector.broadcast %cst_20 : f32 to vector<16x1xf32>
    %71 = arith.addf %69, %70 : vector<16x1xf32>
    %72 = math.rsqrt %71 : vector<16x1xf32>
    %73 = arith.mulf %56, %72 : vector<16x1xf32>
    %74 = arith.mulf %62, %73 : vector<16x1xf32>
    %75 = arith.subf %57, %74 : vector<16x1xf32>
    %76 = vector.broadcast %73 : vector<16x1xf32> to vector<16x256xf32>
    %77 = arith.mulf %58, %76 : vector<16x256xf32>
    %78 = vector.broadcast %75 : vector<16x1xf32> to vector<16x256xf32>
    %79 = arith.addf %77, %78 : vector<16x256xf32>
    %80 = vector.extract_strided_slice %55 {offsets = [0, 256], sizes = [16, 256], strides = [1, 1]} : vector<16x512xf32> to vector<16x256xf32>
    %cst_21 = arith.constant dense<0.000000e+00> : vector<16xf32>
    %81 = vector.multi_reduction <add>, %80, %cst_21 [1] : vector<16x256xf32> to vector<16xf32>
    %82 = vector.shape_cast %81 : vector<16xf32> to vector<16x1xf32>
    %cst_22 = arith.constant 3.906250e-03 : f32
    %83 = vector.broadcast %cst_22 : f32 to vector<16x1xf32>
    %84 = arith.mulf %82, %83 : vector<16x1xf32>
    %85 = arith.mulf %80, %80 : vector<16x256xf32>
    %cst_23 = arith.constant dense<0.000000e+00> : vector<16xf32>
    %86 = vector.multi_reduction <add>, %85, %cst_23 [1] : vector<16x256xf32> to vector<16xf32>
    %87 = vector.shape_cast %86 : vector<16xf32> to vector<16x1xf32>
    %cst_24 = arith.constant 3.906250e-03 : f32
    %88 = vector.broadcast %cst_24 : f32 to vector<16x1xf32>
    %89 = arith.mulf %87, %88 : vector<16x1xf32>
    %90 = arith.mulf %84, %84 : vector<16x1xf32>
    %91 = arith.subf %89, %90 : vector<16x1xf32>
    %cst_25 = arith.constant 9.99999974E-6 : f32
    %92 = vector.broadcast %cst_25 : f32 to vector<16x1xf32>
    %93 = arith.addf %91, %92 : vector<16x1xf32>
    %94 = math.rsqrt %93 : vector<16x1xf32>
    %95 = arith.mulf %56, %94 : vector<16x1xf32>
    %96 = arith.mulf %84, %95 : vector<16x1xf32>
    %97 = arith.subf %57, %96 : vector<16x1xf32>
    %98 = vector.broadcast %95 : vector<16x1xf32> to vector<16x256xf32>
    %99 = arith.mulf %80, %98 : vector<16x256xf32>
    %100 = vector.broadcast %97 : vector<16x1xf32> to vector<16x256xf32>
    %101 = arith.addf %99, %100 : vector<16x256xf32>
    %102 = tpu.concatenate %79, %101 in 1 : vector<16x256xf32>, vector<16x256xf32> -> vector<16x512xf32>
    %c17_i32 = arith.constant 17 : i32
    %103 = tpu.dynamic_rotate %54 by %c17_i32 dim 1 : vector<8x512xf32>, i32 -> vector<8x512xf32>
    %c0_26 = arith.constant 0 : index
    %c0_27 = arith.constant 0 : index
    %104 = vector.load %arg5[%c0_26, %c0_27] : memref<8x512xf32, #tpu.memory_space<vmem>>, vector<1x512xf32>
    %105 = vector.broadcast %104 : vector<1x512xf32> to vector<8x512xf32>
    %106 = arith.mulf %103, %105 : vector<8x512xf32>
    %c16_i32 = arith.constant 16 : i32
    %107 = tpu.dynamic_rotate %54 by %c16_i32 dim 1 : vector<8x512xf32>, i32 -> vector<8x512xf32>
    %c1 = arith.constant 1 : index
    %c0_28 = arith.constant 0 : index
    %108 = vector.load %arg5[%c1, %c0_28] : memref<8x512xf32, #tpu.memory_space<vmem>>, vector<1x512xf32>
    %109 = vector.broadcast %108 : vector<1x512xf32> to vector<8x512xf32>
    %110 = arith.mulf %107, %109 : vector<8x512xf32>
    %c15_i32 = arith.constant 15 : i32
    %111 = tpu.dynamic_rotate %54 by %c15_i32 dim 1 : vector<8x512xf32>, i32 -> vector<8x512xf32>
    %c2 = arith.constant 2 : index
    %c0_29 = arith.constant 0 : index
    %112 = vector.load %arg5[%c2, %c0_29] : memref<8x512xf32, #tpu.memory_space<vmem>>, vector<1x512xf32>
    %113 = vector.broadcast %112 : vector<1x512xf32> to vector<8x512xf32>
    %114 = arith.mulf %111, %113 : vector<8x512xf32>
    %c1_i32 = arith.constant 1 : i32
    %115 = tpu.dynamic_rotate %54 by %c1_i32 dim 1 : vector<8x512xf32>, i32 -> vector<8x512xf32>
    %c3 = arith.constant 3 : index
    %c0_30 = arith.constant 0 : index
    %116 = vector.load %arg5[%c3, %c0_30] : memref<8x512xf32, #tpu.memory_space<vmem>>, vector<1x512xf32>
    %117 = vector.broadcast %116 : vector<1x512xf32> to vector<8x512xf32>
    %118 = arith.mulf %115, %117 : vector<8x512xf32>
    %c511_i32 = arith.constant 511 : i32
    %119 = tpu.dynamic_rotate %54 by %c511_i32 dim 1 : vector<8x512xf32>, i32 -> vector<8x512xf32>
    %c4 = arith.constant 4 : index
    %c0_31 = arith.constant 0 : index
    %120 = vector.load %arg5[%c4, %c0_31] : memref<8x512xf32, #tpu.memory_space<vmem>>, vector<1x512xf32>
    %121 = vector.broadcast %120 : vector<1x512xf32> to vector<8x512xf32>
    %122 = arith.mulf %119, %121 : vector<8x512xf32>
    %c497_i32 = arith.constant 497 : i32
    %123 = tpu.dynamic_rotate %54 by %c497_i32 dim 1 : vector<8x512xf32>, i32 -> vector<8x512xf32>
    %c5 = arith.constant 5 : index
    %c0_32 = arith.constant 0 : index
    %124 = vector.load %arg5[%c5, %c0_32] : memref<8x512xf32, #tpu.memory_space<vmem>>, vector<1x512xf32>
    %125 = vector.broadcast %124 : vector<1x512xf32> to vector<8x512xf32>
    %126 = arith.mulf %123, %125 : vector<8x512xf32>
    %c496_i32 = arith.constant 496 : i32
    %127 = tpu.dynamic_rotate %54 by %c496_i32 dim 1 : vector<8x512xf32>, i32 -> vector<8x512xf32>
    %c6 = arith.constant 6 : index
    %c0_33 = arith.constant 0 : index
    %128 = vector.load %arg5[%c6, %c0_33] : memref<8x512xf32, #tpu.memory_space<vmem>>, vector<1x512xf32>
    %129 = vector.broadcast %128 : vector<1x512xf32> to vector<8x512xf32>
    %130 = arith.mulf %127, %129 : vector<8x512xf32>
    %c495_i32 = arith.constant 495 : i32
    %131 = tpu.dynamic_rotate %54 by %c495_i32 dim 1 : vector<8x512xf32>, i32 -> vector<8x512xf32>
    %c7 = arith.constant 7 : index
    %c0_34 = arith.constant 0 : index
    %132 = vector.load %arg5[%c7, %c0_34] : memref<8x512xf32, #tpu.memory_space<vmem>>, vector<1x512xf32>
    %133 = vector.broadcast %132 : vector<1x512xf32> to vector<8x512xf32>
    %134 = arith.mulf %131, %133 : vector<8x512xf32>
    %135 = tpu.concatenate %106, %110, %114, %118, %54, %122, %126, %130, %134 in 0 : vector<8x512xf32>, vector<8x512xf32>, vector<8x512xf32>, vector<8x512xf32>, vector<8x512xf32>, vector<8x512xf32>, vector<8x512xf32>, vector<8x512xf32>, vector<8x512xf32> -> vector<72x512xf32>
    %c0_35 = arith.constant 0 : index
    %c0_36 = arith.constant 0 : index
    %136 = vector.load %arg3[%c0_35, %c0_36] : memref<8x72xf32, #tpu.memory_space<vmem>>, vector<8x72xf32>
    %cst_37 = arith.constant dense<0.000000e+00> : vector<8x512xf32>
    %137 = tpu.matmul %136, %135, %cst_37 {dimension_numbers = #tpu.dot_dimension_numbers<[1], [0], [0], [1], [0, 0, 1, 1], [], []>} : vector<8x72xf32>, vector<72x512xf32>, vector<8x512xf32> -> vector<8x512xf32>
    %138 = vector.extract_strided_slice %1 {offsets = [0, 2], sizes = [8, 1], strides = [1, 1]} : vector<16x8xf32> to vector<8x1xf32>
    %139 = vector.extract_strided_slice %1 {offsets = [0, 3], sizes = [8, 1], strides = [1, 1]} : vector<16x8xf32> to vector<8x1xf32>
    %140 = vector.extract_strided_slice %137 {offsets = [0, 0], sizes = [8, 256], strides = [1, 1]} : vector<8x512xf32> to vector<8x256xf32>
    %cst_38 = arith.constant dense<0.000000e+00> : vector<8xf32>
    %141 = vector.multi_reduction <add>, %140, %cst_38 [1] : vector<8x256xf32> to vector<8xf32>
    %142 = vector.shape_cast %141 : vector<8xf32> to vector<8x1xf32>
    %cst_39 = arith.constant 3.906250e-03 : f32
    %143 = vector.broadcast %cst_39 : f32 to vector<8x1xf32>
    %144 = arith.mulf %142, %143 : vector<8x1xf32>
    %145 = arith.mulf %140, %140 : vector<8x256xf32>
    %cst_40 = arith.constant dense<0.000000e+00> : vector<8xf32>
    %146 = vector.multi_reduction <add>, %145, %cst_40 [1] : vector<8x256xf32> to vector<8xf32>
    %147 = vector.shape_cast %146 : vector<8xf32> to vector<8x1xf32>
    %cst_41 = arith.constant 3.906250e-03 : f32
    %148 = vector.broadcast %cst_41 : f32 to vector<8x1xf32>
    %149 = arith.mulf %147, %148 : vector<8x1xf32>
    %150 = arith.mulf %144, %144 : vector<8x1xf32>
    %151 = arith.subf %149, %150 : vector<8x1xf32>
    %cst_42 = arith.constant 9.99999974E-6 : f32
    %152 = vector.broadcast %cst_42 : f32 to vector<8x1xf32>
    %153 = arith.addf %151, %152 : vector<8x1xf32>
    %154 = math.rsqrt %153 : vector<8x1xf32>
    %155 = arith.mulf %138, %154 : vector<8x1xf32>
    %156 = arith.mulf %144, %155 : vector<8x1xf32>
    %157 = arith.subf %139, %156 : vector<8x1xf32>
    %158 = vector.broadcast %155 : vector<8x1xf32> to vector<8x256xf32>
    %159 = arith.mulf %140, %158 : vector<8x256xf32>
    %160 = vector.broadcast %157 : vector<8x1xf32> to vector<8x256xf32>
    %161 = arith.addf %159, %160 : vector<8x256xf32>
    %162 = vector.extract_strided_slice %137 {offsets = [0, 256], sizes = [8, 256], strides = [1, 1]} : vector<8x512xf32> to vector<8x256xf32>
    %cst_43 = arith.constant dense<0.000000e+00> : vector<8xf32>
    %163 = vector.multi_reduction <add>, %162, %cst_43 [1] : vector<8x256xf32> to vector<8xf32>
    %164 = vector.shape_cast %163 : vector<8xf32> to vector<8x1xf32>
    %cst_44 = arith.constant 3.906250e-03 : f32
    %165 = vector.broadcast %cst_44 : f32 to vector<8x1xf32>
    %166 = arith.mulf %164, %165 : vector<8x1xf32>
    %167 = arith.mulf %162, %162 : vector<8x256xf32>
    %cst_45 = arith.constant dense<0.000000e+00> : vector<8xf32>
    %168 = vector.multi_reduction <add>, %167, %cst_45 [1] : vector<8x256xf32> to vector<8xf32>
    %169 = vector.shape_cast %168 : vector<8xf32> to vector<8x1xf32>
    %cst_46 = arith.constant 3.906250e-03 : f32
    %170 = vector.broadcast %cst_46 : f32 to vector<8x1xf32>
    %171 = arith.mulf %169, %170 : vector<8x1xf32>
    %172 = arith.mulf %166, %166 : vector<8x1xf32>
    %173 = arith.subf %171, %172 : vector<8x1xf32>
    %cst_47 = arith.constant 9.99999974E-6 : f32
    %174 = vector.broadcast %cst_47 : f32 to vector<8x1xf32>
    %175 = arith.addf %173, %174 : vector<8x1xf32>
    %176 = math.rsqrt %175 : vector<8x1xf32>
    %177 = arith.mulf %138, %176 : vector<8x1xf32>
    %178 = arith.mulf %166, %177 : vector<8x1xf32>
    %179 = arith.subf %139, %178 : vector<8x1xf32>
    %180 = vector.broadcast %177 : vector<8x1xf32> to vector<8x256xf32>
    %181 = arith.mulf %162, %180 : vector<8x256xf32>
    %182 = vector.broadcast %179 : vector<8x1xf32> to vector<8x256xf32>
    %183 = arith.addf %181, %182 : vector<8x256xf32>
    %184 = tpu.concatenate %161, %183 in 1 : vector<8x256xf32>, vector<8x256xf32> -> vector<8x512xf32>
    %cst_48 = arith.constant 0.00999999977 : f32
    %185 = vector.broadcast %cst_48 : f32 to vector<8x512xf32>
    %186 = arith.mulf %185, %184 : vector<8x512xf32>
    %187 = arith.maximumf %184, %186 : vector<8x512xf32>
    %c0_49 = arith.constant 0 : index
    %c0_50 = arith.constant 0 : index
    %188 = vector.load %arg4[%c0_49, %c0_50] : memref<16x8xf32, #tpu.memory_space<vmem>>, vector<16x8xf32>
    %cst_51 = arith.constant dense<0.000000e+00> : vector<16x512xf32>
    %189 = tpu.matmul %188, %187, %cst_51 {dimension_numbers = #tpu.dot_dimension_numbers<[1], [0], [0], [1], [0, 0, 1, 1], [], []>} : vector<16x8xf32>, vector<8x512xf32>, vector<16x512xf32> -> vector<16x512xf32>
    %190 = vector.extract_strided_slice %1 {offsets = [0, 4], sizes = [16, 1], strides = [1, 1]} : vector<16x8xf32> to vector<16x1xf32>
    %191 = vector.extract_strided_slice %1 {offsets = [0, 5], sizes = [16, 1], strides = [1, 1]} : vector<16x8xf32> to vector<16x1xf32>
    %192 = vector.extract_strided_slice %189 {offsets = [0, 0], sizes = [16, 256], strides = [1, 1]} : vector<16x512xf32> to vector<16x256xf32>
    %cst_52 = arith.constant dense<0.000000e+00> : vector<16xf32>
    %193 = vector.multi_reduction <add>, %192, %cst_52 [1] : vector<16x256xf32> to vector<16xf32>
    %194 = vector.shape_cast %193 : vector<16xf32> to vector<16x1xf32>
    %cst_53 = arith.constant 3.906250e-03 : f32
    %195 = vector.broadcast %cst_53 : f32 to vector<16x1xf32>
    %196 = arith.mulf %194, %195 : vector<16x1xf32>
    %197 = arith.mulf %192, %192 : vector<16x256xf32>
    %cst_54 = arith.constant dense<0.000000e+00> : vector<16xf32>
    %198 = vector.multi_reduction <add>, %197, %cst_54 [1] : vector<16x256xf32> to vector<16xf32>
    %199 = vector.shape_cast %198 : vector<16xf32> to vector<16x1xf32>
    %cst_55 = arith.constant 3.906250e-03 : f32
    %200 = vector.broadcast %cst_55 : f32 to vector<16x1xf32>
    %201 = arith.mulf %199, %200 : vector<16x1xf32>
    %202 = arith.mulf %196, %196 : vector<16x1xf32>
    %203 = arith.subf %201, %202 : vector<16x1xf32>
    %cst_56 = arith.constant 9.99999974E-6 : f32
    %204 = vector.broadcast %cst_56 : f32 to vector<16x1xf32>
    %205 = arith.addf %203, %204 : vector<16x1xf32>
    %206 = math.rsqrt %205 : vector<16x1xf32>
    %207 = arith.mulf %190, %206 : vector<16x1xf32>
    %208 = arith.mulf %196, %207 : vector<16x1xf32>
    %209 = arith.subf %191, %208 : vector<16x1xf32>
    %210 = vector.broadcast %207 : vector<16x1xf32> to vector<16x256xf32>
    %211 = arith.mulf %192, %210 : vector<16x256xf32>
    %212 = vector.broadcast %209 : vector<16x1xf32> to vector<16x256xf32>
    %213 = arith.addf %211, %212 : vector<16x256xf32>
    %214 = vector.extract_strided_slice %189 {offsets = [0, 256], sizes = [16, 256], strides = [1, 1]} : vector<16x512xf32> to vector<16x256xf32>
    %cst_57 = arith.constant dense<0.000000e+00> : vector<16xf32>
    %215 = vector.multi_reduction <add>, %214, %cst_57 [1] : vector<16x256xf32> to vector<16xf32>
    %216 = vector.shape_cast %215 : vector<16xf32> to vector<16x1xf32>
    %cst_58 = arith.constant 3.906250e-03 : f32
    %217 = vector.broadcast %cst_58 : f32 to vector<16x1xf32>
    %218 = arith.mulf %216, %217 : vector<16x1xf32>
    %219 = arith.mulf %214, %214 : vector<16x256xf32>
    %cst_59 = arith.constant dense<0.000000e+00> : vector<16xf32>
    %220 = vector.multi_reduction <add>, %219, %cst_59 [1] : vector<16x256xf32> to vector<16xf32>
    %221 = vector.shape_cast %220 : vector<16xf32> to vector<16x1xf32>
    %cst_60 = arith.constant 3.906250e-03 : f32
    %222 = vector.broadcast %cst_60 : f32 to vector<16x1xf32>
    %223 = arith.mulf %221, %222 : vector<16x1xf32>
    %224 = arith.mulf %218, %218 : vector<16x1xf32>
    %225 = arith.subf %223, %224 : vector<16x1xf32>
    %cst_61 = arith.constant 9.99999974E-6 : f32
    %226 = vector.broadcast %cst_61 : f32 to vector<16x1xf32>
    %227 = arith.addf %225, %226 : vector<16x1xf32>
    %228 = math.rsqrt %227 : vector<16x1xf32>
    %229 = arith.mulf %190, %228 : vector<16x1xf32>
    %230 = arith.mulf %218, %229 : vector<16x1xf32>
    %231 = arith.subf %191, %230 : vector<16x1xf32>
    %232 = vector.broadcast %229 : vector<16x1xf32> to vector<16x256xf32>
    %233 = arith.mulf %214, %232 : vector<16x256xf32>
    %234 = vector.broadcast %231 : vector<16x1xf32> to vector<16x256xf32>
    %235 = arith.addf %233, %234 : vector<16x256xf32>
    %236 = tpu.concatenate %213, %235 in 1 : vector<16x256xf32>, vector<16x256xf32> -> vector<16x512xf32>
    %237 = arith.addf %236, %102 : vector<16x512xf32>
    %cst_62 = arith.constant 0.00999999977 : f32
    %238 = vector.broadcast %cst_62 : f32 to vector<16x512xf32>
    %239 = arith.mulf %238, %237 : vector<16x512xf32>
    %240 = arith.maximumf %237, %239 : vector<16x512xf32>
    %c0_63 = arith.constant 0 : index
    %c0_64 = arith.constant 0 : index
    %241 = vector.load %arg7[%c0_63, %c0_64] : memref<16x512xf32, #tpu.memory_space<vmem>>, vector<16x512xf32>
    tpu.vector_store %arg7[%c0_63, %c0_64], %240 {strides = array<i32>} : memref<16x512xf32, #tpu.memory_space<vmem>>, vector<16x512xf32>,
    return
  }
  func.func @transform_0(%arg0: i32) -> (i32, i32) {
    %c0_i32 = arith.constant 0 : i32
    %c0_i32_0 = arith.constant 0 : i32
    %c0_i32_1 = arith.constant 0 : i32
    return %c0_i32, %c0_i32_0 : i32, i32
  }
  func.func @transform_1(%arg0: i32) -> (i32, i32) {
    %c0_i32 = arith.constant 0 : i32
    %c0_i32_0 = arith.constant 0 : i32
    %c0_i32_1 = arith.constant 0 : i32
    return %c0_i32, %c0_i32_0 : i32, i32
  }
  func.func @transform_2(%arg0: i32) -> (i32, i32) {
    %c0_i32 = arith.constant 0 : i32
    %c0_i32_0 = arith.constant 0 : i32
    %c0_i32_1 = arith.constant 0 : i32
    return %c0_i32, %c0_i32_0 : i32, i32
  }
  func.func @transform_3(%arg0: i32) -> (i32, i32) {
    %c0_i32 = arith.constant 0 : i32
    %c0_i32_0 = arith.constant 0 : i32
    %c0_i32_1 = arith.constant 0 : i32
    return %c0_i32, %c0_i32_0 : i32, i32
  }
  func.func @transform_4(%arg0: i32) -> (i32, i32) {
    %c0_i32 = arith.constant 0 : i32
    %c0_i32_0 = arith.constant 0 : i32
    %c0_i32_1 = arith.constant 0 : i32
    return %c0_i32, %c0_i32_0 : i32, i32
  }
  func.func @transform_5(%arg0: i32) -> (i32, i32) {
    %c0_i32 = arith.constant 0 : i32
    %c0_i32_0 = arith.constant 0 : i32
    %c0_i32_1 = arith.constant 0 : i32
    return %c0_i32, %c0_i32_0 : i32, i32
  }
  func.func @transform_6(%arg0: i32) -> (i32, i32) {
    %c0_i32 = arith.constant 0 : i32
    %c0_i32_0 = arith.constant 0 : i32
    %c0_i32_1 = arith.constant 0 : i32
    return %c0_i32, %c0_i32_0 : i32, i32
  }
}

</mosaic_0001>

<bundles_post_ra>
// kernel: tpu_custom_call.1
= control target key start
LH: loop header
LB: loop body
LE: loop exit
PB: predicated region body
PF: predicated region fallthrough
CT: control target
= control target key end

     0   :  { %vm45_vm0 = vcmask 1043456   ;;  %v1477_v3 = vmov 0.0   ;;  %s1942_s0 = inlined_call_operand.vmem [shape: f32[4,512], index: 0, kind: input, shape index: {}]   ;;  %s1943_s1 = inlined_call_operand.vmem [shape: f32[24,4], index: 1, kind: input, shape index: {}]   ;;  %s1944_s2 = inlined_call_operand.vmem [shape: f32[8,72], index: 2, kind: input, shape index: {}]   ;;  %s1945_s3 = inlined_call_operand.vmem [shape: f32[16,8], index: 3, kind: input, shape index: {}]   ;;  %s1946_s4 = inlined_call_operand.vmem [shape: f32[8,512], index: 4, kind: input, shape index: {}]   ;;  %s1947_s5 = inlined_call_operand.vmem [shape: f32[16,8], index: 5, kind: input, shape index: {}]   ;;  %s1948_s6 = inlined_call_operand.hbm [shape: f32[16,512], index: 6, kind: output, shape index: {}]  }
   0x1   :  { %v24_v0 = vld [vmem:[%s1942_s0] sm:$0xff]  ;;  %v25_v1 = vld [vmem:[%s1942_s0 + $0x8] sm:$0xff]  ;;  %118 = vmatprep.mubr.f32.mxu0 %v1477_v3  ;;  %201 = vmatprep.mubr.f32.mxu1 %v1477_v3 }
   0x2   :  { %v33_v2 = vcombine.high %v24_v0, %v24_v0  ;;  %v34_v4 = vcombine.high %v25_v1, %v25_v1 }
   0x3   :  { %11 = vsyncpa [#allocation3], 0  ;;  %v28_v5 = vld [vmem:[%s1943_s1] sm:$0xff]  ;;  %vm35_vm1 = vcmask 31744   ;;  %v1478_v18 = vmov 0   ;;  %v1479_v33 = vmov 1  }
   0x4   :  { %1335 = vmatprep.subr.msk.mxu0 %vm45_vm0, %v33_v2  ;;  %1340 = vmatprep.subr.msk.mxu1 %vm45_vm0, %v34_v4  ;;  %v1550_v34 = vld [vmem:[%s1947_s5] sm:$0xff]  ;;  %s1480_s28 = smov 1   ;;  %s1481_s29 = smov 17   ;;  %v30_v2 = vld [vmem:[%s1943_s1 + $0x10] sm:$0xff]  ;;  %v446_v4 = vlaneseq  ;;  %vm760_vm10 = vcmask 588800   ;;  %vm986_vm11 = vcmask 64512  }
   0x5   :  { %1336 = vmatpush1.msk.msra.mxu0 %vm45_vm0, %v24_v0  ;;  %1341 = vmatpush1.msk.msra.mxu1 %vm45_vm0, %v25_v1  ;;  %s1482_s30 = smov 16   ;;  %s1483_s7 = smov 15   ;;  %v29_v1 = vld [vmem:[%s1943_s1 + $0x8] sm:$0xff] }
   0x6   :  { %1337 = vmatmul.mubr.msk.f32.vlgmr.msra.gmra.mrb[0].mxu0 %vm35_vm1, %v28_v5  ;;  %1342 = vmatmul.mubr.msk.f32.vlgmr.msra.gmra.mrb[0].mxu1 %vm35_vm1, %v28_v5  ;;  %s1484_s8 = smov 127   ;;  %s1485_s9 = smov 113   ;;  %v456_v5 = vshrl.u32 %v446_v4, 7 }
   0x7   :  { %207 = vmatprep.mubr.f32.mxu1 %v1477_v3  ;;  %124 = vmatprep.mubr.f32.mxu0 %v1477_v3  ;;  %s1486_s14 = smov 112   ;;  %s1487_s15 = smov 111  }
   0x8   :  { %1410 = vset.pattern.permute.xlu1 %v1478_v18  ;;  %1411 = vset.pattern.permute.xlu0 %v1479_v33 }
   0xa   :  { %1343 = vmatmul.mubr.msk.f32.gmra.mrb[2].mxu1 %vm35_vm1, %v29_v1  ;;  %1338 = vmatmul.mubr.msk.f32.gmra.mrb[2].mxu0 %vm35_vm1, %v29_v1 }
   0xb   :  { %213 = vmatprep.mubr.f32.mxu1 %v1477_v3  ;;  %130 = vmatprep.mubr.f32.mxu0 %v1477_v3 }
   0xe   :  { %1344 = vmatmul.mubr.msk.f32.gmra.mrb[4].mxu1 %vm35_vm1, %v30_v2  ;;  %1339 = vmatmul.mubr.msk.f32.gmra.mrb[4].mxu0 %vm35_vm1, %v30_v2 }
   0xf   :  { %899 = vmatprep.mubr.f32.mxu1 %v1477_v3  ;;  %828 = vmatprep.mubr.f32.mxu0 %v1477_v3 }
  0xd9   :  { %v120_v6 = vpop.f32.mrb[0].mxu0  ;;  %v203_v7 = vpop.f32.mrb[0].mxu1 }
  0xda   :  { %v122_v8 = vpop.f32.mrb[1].mxu0  ;;  %v205_v9 = vpop.f32.mrb[1].mxu1  ;;  %v224_v10 = vmul.f32 %v120_v6, %v120_v6  ;;  %v259_v11 = vmul.f32 %v203_v7, %v203_v7 }
  0xdb   :  { %v220_v12 = vadd.f32 %v122_v8, %v120_v6  ;;  %v225_v13 = vmul.f32 %v122_v8, %v122_v8  ;;  %v255_v14 = vadd.f32 %v205_v9, %v203_v7  ;;  %v260_v15 = vmul.f32 %v205_v9, %v205_v9 }
  0xdd   :  { %221 = vadd.xlane.f32.xlu0 %v220_v12  ;;  %v226_v16 = vadd.f32 %v225_v13, %v224_v10  ;;  %v261_v17 = vadd.f32 %v260_v15, %v259_v11  ;;  %v453_v10 = vld [vmem:[%s1946_s4] ss:$8 sm:$0xf]  ;;  %v1345_v11 = vld [vmem:[%s1946_s4 + $0x1] ss:$8 sm:$0xf] }
  0xde   :  { %v1627_v12 = vsub.s32 0, %v456_v5  ;;  %v1631_v15 = vsub.s32 3, %v456_v5 }
  0xdf   :  { %227 = vadd.xlane.f32.xlu1 %v226_v16 }
  0xe1   :  { %256 = vadd.xlane.f32.xlu0 %v255_v14  ;;  %v1629_v14 = vsub.s32 2, %v456_v5 }
  0xe3   :  { %262 = vadd.xlane.f32.xlu1 %v261_v17 }
 0x16a   :  { %v222_v19 = vpop.xlane.xlu0 %221 }
 0x16b   :  { %v223_v20 = vmul.f32 0.00390625, %v222_v19 }
 0x16c   :  { %v228_v21 = vpop.xlane.xlu1 %227 }
 0x16d   :  { %v230_v22 = vmul.f32 %v223_v20, %v223_v20  ;;  %v229_v23 = vmul.f32 0.00390625, %v228_v21  ;;  %v466_v21 = vrot.slane %v453_v10, %v1629_v14 }
 0x16e   :  { %v257_v24 = vpop.xlane.xlu0 %256 }
 0x16f   :  { %v231_v25 = vsub.f32 %v229_v23, %v230_v22  ;;  %v258_v26 = vmul.f32 0.00390625, %v257_v24  ;;  %v470_v22 = vrot.slane %v453_v10, %v1631_v15 }
 0x170   :  { %v263_v27 = vpop.xlane.xlu1 %262 }
 0x171   :  { %v232_v28 = vadd.f32 1e-05, %v231_v25  ;;  %v265_v29 = vmul.f32 %v258_v26, %v258_v26  ;;  %v264_v30 = vmul.f32 0.00390625, %v263_v27  ;;  %v498_v27 = vrot.slane %v1345_v11, %v1627_v12 }
 0x173   :  { %1428 = vrsqrt.f32 %v232_v28  ;;  %v266_v31 = vsub.f32 %v264_v30, %v265_v29  ;;  %v506_v28 = vrot.slane %v1345_v11, %v1629_v14 }
 0x175   :  { %v267_v32 = vadd.f32 1e-05, %v266_v31 }
 0x177   :  { %1430 = vrsqrt.f32 %v267_v32  ;;  %v510_v32 = vrot.slane %v1345_v11, %v1631_v15 }
 0x17d   :  { %v1429_v35 = vpop.eup %1428 }
 0x17e   :  { %v234_v36 = vmul.f32 %v1429_v35, %v1550_v34 }
 0x180   :  { %v235_v37 = vmul.f32 %v234_v36, %v223_v20  ;;  %v458_v20 = vrot.slane %v453_v10, %v1627_v12 }
 0x181   :  { %v1431_v38 = vpop.eup %1430 }
 0x182   :  { %237 = vrot.lane.b32.xlu0 %v235_v37, %s1480_s28  ;;  %v269_v39 = vmul.f32 %v1431_v38, %v1550_v34 }
 0x184   :  { %v270_v40 = vmul.f32 %v269_v39, %v258_v26 }
 0x186   :  { %272 = vrot.lane.b32.xlu1 %v270_v40, %s1480_s28 }
 0x18a   :  { %243 = vperm.xlu1 %1410, %v234_v36  }
 0x18e   :  { %278 = vperm.xlu1 %1410, %v269_v39  }
 0x192   :  { %1412 = vset.pattern.permute.xlu1 %v1479_v33 }
 0x1f4   :  { %v238_v41 = vpop.permute.xlu0 %237 }
 0x1f5   :  { %v240_v42 = vsub.f32 %v1550_v34, %v238_v41 }
 0x1f7   :  { %250 = vperm.xlu0 %1411, %v240_v42  }
 0x1f8   :  { %v273_v43 = vpop.permute.xlu1 %272 }
 0x1f9   :  { %v275_v44 = vsub.f32 %v1550_v34, %v273_v43 }
 0x1fb   :  { %285 = vperm.xlu1 %1412, %v275_v44  }
 0x209   :  { %v244_v45 = vpop.permute.xlu1 %243 }
 0x20a   :  { %v246_v46 = vmul.f32 %v244_v45, %v120_v6  ;;  %v247_v47 = vmul.f32 %v244_v45, %v122_v8 }
 0x20d   :  { %v279_v48 = vpop.permute.xlu1 %278 }
 0x20e   :  { %v281_v52 = vmul.f32 %v279_v48, %v203_v7  ;;  %v282_v53 = vmul.f32 %v279_v48, %v205_v9  ;;  %v1616_v7 = vand.u32 127, %v446_v4  ;;  %v1618_v9 = vsub.s32 1, %v456_v5 }
 0x210   :  { %vm448_vm2 = vcmp.lt.s32.totalorder %v1616_v7, 17  ;;  %v462_v17 = vrot.slane %v453_v10, %v1618_v9  ;;  %vm487_vm3 = vcmp.lt.s32.totalorder %v1616_v7, 16  ;;  %v502_v18 = vrot.slane %v1345_v11, %v1618_v9 }
 0x211   :  { %vm527_vm4 = vcmp.lt.s32.totalorder %v1616_v7, 15  ;;  %vm567_vm5 = vcmp.lt.s32.totalorder %v1616_v7, 1  ;;  %vm607_vm6 = vcmp.lt.s32.totalorder %v1616_v7, 127  ;;  %vm687_vm7 = vcmp.lt.s32.totalorder %v1616_v7, 112 }
 0x212   :  { %vm647_vm8 = vcmp.lt.s32.totalorder %v1616_v7, 113  ;;  %vm727_vm9 = vcmp.lt.s32.totalorder %v1616_v7, 111 }
 0x276   :  { %v251_v49 = vpop.permute.xlu0 %250 }
 0x277   :  { %v253_v50 = vadd.f32 %v251_v49, %v246_v46  ;;  %v254_v51 = vadd.f32 %v251_v49, %v247_v47 }
 0x279   :  { %v290_v54 = vmul.f32 0.01, %v253_v50  ;;  %v291_v55 = vmul.f32 0.01, %v254_v51 }
 0x27a   :  { %v286_v56 = vpop.permute.xlu1 %285 }
 0x27b   :  { %v1558_v57 = vmax.f32 %v253_v50, %v290_v54  ;;  %v1560_v58 = vmax.f32 %v254_v51, %v291_v55  ;;  %v288_v59 = vadd.f32 %v286_v56, %v281_v52  ;;  %v289_v60 = vadd.f32 %v286_v56, %v282_v53  ;;  %v1346_v52 = vld [vmem:[%s1946_s4 + $0x2] ss:$8 sm:$0xf]  ;;  %v1347_v53 = vld [vmem:[%s1946_s4 + $0x3] ss:$8 sm:$0xf] }
 0x27c   :  { %v542_v56 = vrot.slane %v1346_v52, %v1618_v9  ;;  %v550_v1 = vrot.slane %v1346_v52, %v1631_v15  ;;  %v586_v10 = vrot.slane %v1347_v53, %v1629_v14 }
 0x27d   :  { %v292_v61 = vmul.f32 0.01, %v288_v59  ;;  %v293_v62 = vmul.f32 0.01, %v289_v60  ;;  %440 = vrot.lane.b32.xlu0 %v1560_v58, %s1481_s29  ;;  %438 = vrot.lane.b32.xlu1 %v1558_v57, %s1481_s29 }
 0x27f   :  { %v1564_v63 = vmax.f32 %v288_v59, %v292_v61  ;;  %v1566_v0 = vmax.f32 %v289_v60, %v293_v62  ;;  %v582_v59 = vrot.slane %v1347_v53, %v1618_v9  ;;  %v538_v61 = vrot.slane %v1346_v52, %v1627_v12 }
 0x280   :  { %v546_v62 = vrot.slane %v1346_v52, %v1629_v14 }
 0x281   :  { %444 = vrot.lane.b32.xlu0 %v1566_v0, %s1481_s29  ;;  %442 = vrot.lane.b32.xlu1 %v1564_v63, %s1481_s29 }
 0x285   :  { %481 = vrot.lane.b32.xlu0 %v1560_v58, %s1482_s30  ;;  %479 = vrot.lane.b32.xlu1 %v1558_v57, %s1482_s30 }
 0x289   :  { %485 = vrot.lane.b32.xlu0 %v1566_v0, %s1482_s30  ;;  %483 = vrot.lane.b32.xlu1 %v1564_v63, %s1482_s30 }
 0x28d   :  { %521 = vrot.lane.b32.xlu0 %v1560_v58, %s1483_s7  ;;  %519 = vrot.lane.b32.xlu1 %v1558_v57, %s1483_s7 }
 0x291   :  { %525 = vrot.lane.b32.xlu0 %v1566_v0, %s1483_s7  ;;  %523 = vrot.lane.b32.xlu1 %v1564_v63, %s1483_s7 }
 0x295   :  { %561 = vrot.lane.b32.xlu0 %v1560_v58, %s1480_s28  ;;  %559 = vrot.lane.b32.xlu1 %v1558_v57, %s1480_s28 }
 0x299   :  { %565 = vrot.lane.b32.xlu0 %v1566_v0, %s1480_s28  ;;  %563 = vrot.lane.b32.xlu1 %v1564_v63, %s1480_s28 }
 0x29d   :  { %601 = vrot.lane.b32.xlu0 %v1560_v58, %s1484_s8  ;;  %599 = vrot.lane.b32.xlu1 %v1558_v57, %s1484_s8 }
 0x2a1   :  { %605 = vrot.lane.b32.xlu0 %v1566_v0, %s1484_s8  ;;  %603 = vrot.lane.b32.xlu1 %v1564_v63, %s1484_s8 }
 0x2a5   :  { %641 = vrot.lane.b32.xlu0 %v1560_v58, %s1485_s9  ;;  %639 = vrot.lane.b32.xlu1 %v1558_v57, %s1485_s9 }
 0x2a9   :  { %645 = vrot.lane.b32.xlu0 %v1566_v0, %s1485_s9  ;;  %643 = vrot.lane.b32.xlu1 %v1564_v63, %s1485_s9 }
 0x2ad   :  { %681 = vrot.lane.b32.xlu0 %v1560_v58, %s1486_s14  ;;  %679 = vrot.lane.b32.xlu1 %v1558_v57, %s1486_s14 }
 0x2b1   :  { %685 = vrot.lane.b32.xlu0 %v1566_v0, %s1486_s14  ;;  %683 = vrot.lane.b32.xlu1 %v1564_v63, %s1486_s14 }
 0x2b5   :  { %721 = vrot.lane.b32.xlu0 %v1560_v58, %s1487_s15  ;;  %719 = vrot.lane.b32.xlu1 %v1558_v57, %s1487_s15 }
 0x2b9   :  { %725 = vrot.lane.b32.xlu0 %v1566_v0, %s1487_s15  ;;  %723 = vrot.lane.b32.xlu1 %v1564_v63, %s1487_s15 }
 0x2ef   :  { %v441_v6 = vpop.permute.xlu0 %440  ;;  %v439_v8 = vpop.permute.xlu1 %438 }
 0x2f0   :  { %v451_v19 = vsel %vm448_vm2, %v439_v8, %v441_v6 }
 0x2f1   :  { %v476_v29 = vmul.f32 %v462_v17, %v451_v19  ;;  %v590_v17 = vrot.slane %v1347_v53, %v1631_v15 }
 0x2f3   :  { %v445_v13 = vpop.permute.xlu0 %444  ;;  %v443_v16 = vpop.permute.xlu1 %442 }
 0x2f4   :  { %v452_v25 = vsel %vm448_vm2, %v445_v13, %v439_v8  ;;  %v450_v30 = vsel %vm448_vm2, %v441_v6, %v443_v16  ;;  %v449_v33 = vsel %vm448_vm2, %v443_v16, %v445_v13  ;;  %v578_v8 = vrot.slane %v1347_v53, %v1627_v12 }
 0x2f5   :  { %v475_v35 = vmul.f32 %v458_v20, %v452_v25  ;;  %v477_v39 = vmul.f32 %v466_v21, %v450_v30  ;;  %v478_v43 = vmul.f32 %v470_v22, %v449_v33 }
 0x2f7   :  { %v482_v23 = vpop.permute.xlu0 %481  ;;  %v480_v24 = vpop.permute.xlu1 %479 }
 0x2f8   :  { %v490_v26 = vsel %vm487_vm3, %v480_v24, %v482_v23 }
 0x2f9   :  { %v516_v31 = vmul.f32 %v502_v18, %v490_v26 }
 0x2fb   :  { %v486_v36 = vpop.permute.xlu0 %485  ;;  %v484_v37 = vpop.permute.xlu1 %483  ;;  %v1358_v38 = vpack.c.bf16 %v516_v31, %v476_v29  ;;  %v1348_v31 = vld [vmem:[%s1946_s4 + $0x4] ss:$8 sm:$0xf] }
 0x2fc   :  { %v491_v40 = vsel %vm487_vm3, %v486_v36, %v480_v24  ;;  %v488_v41 = vsel %vm487_vm3, %v484_v37, %v486_v36  ;;  %v489_v42 = vsel %vm487_vm3, %v482_v23, %v484_v37 }
 0x2fd   :  { %v515_v44 = vmul.f32 %v498_v27, %v491_v40  ;;  %v517_v45 = vmul.f32 %v506_v28, %v489_v42  ;;  %v518_v46 = vmul.f32 %v510_v32, %v488_v41  ;;  %1359 = vmatprep.subr.bf16.mxu0 %v1358_v38  ;;  %v618_v38 = vrot.slane %v1348_v31, %v1627_v12 }
 0x2fe   :  { %v622_v41 = vrot.slane %v1348_v31, %v1618_v9  ;;  %v626_v42 = vrot.slane %v1348_v31, %v1629_v14 }
 0x2ff   :  { %v1360_v47 = vpack.c.bf16 %v515_v44, %v475_v35  ;;  %v1376_v48 = vpack.c.bf16 %v517_v45, %v477_v39  ;;  %v522_v49 = vpop.permute.xlu0 %521  ;;  %v520_v50 = vpop.permute.xlu1 %519  ;;  %v1374_v51 = vpack.c.bf16 %v518_v46, %v478_v43  ;;  %v630_v39 = vrot.slane %v1348_v31, %v1631_v15 }
 0x300   :  { %v530_v60 = vsel %vm527_vm4, %v520_v50, %v522_v49 }
 0x301   :  { %1361 = vmatpush1.bf16.msra.mxu0 %v1360_v47  ;;  %1375 = vmatprep.subr.bf16.mxu1 %v1374_v51  ;;  %v556_v11 = vmul.f32 %v542_v56, %v530_v60 }
 0x302   :  { %1377 = vmatpush1.bf16.msra.mxu1 %v1376_v48 }
 0x303   :  { %v526_v54 = vpop.permute.xlu0 %525  ;;  %v524_v55 = vpop.permute.xlu1 %523 }
 0x304   :  { %v531_v5 = vsel %vm527_vm4, %v526_v54, %v520_v50  ;;  %v529_v13 = vsel %vm527_vm4, %v522_v49, %v524_v55  ;;  %v528_v18 = vsel %vm527_vm4, %v524_v55, %v526_v54 }
 0x305   :  { %v555_v19 = vmul.f32 %v538_v61, %v531_v5  ;;  %v557_v23 = vmul.f32 %v546_v62, %v529_v13  ;;  %v558_v27 = vmul.f32 %v550_v1, %v528_v18  ;;  %v1350_v62 = vld [vmem:[%s1946_s4 + $0x6] ss:$8 sm:$0xf] }
 0x306   :  { %v706_v13 = vrot.slane %v1350_v62, %v1629_v14 }
 0x307   :  { %v562_v2 = vpop.permute.xlu0 %561  ;;  %v560_v4 = vpop.permute.xlu1 %559 }
 0x308   :  { %v570_v6 = vsel %vm567_vm5, %v560_v4, %v562_v2 }
 0x309   :  { %v596_v16 = vmul.f32 %v582_v59, %v570_v6  ;;  %v698_v6 = vrot.slane %v1350_v62, %v1627_v12 }
 0x30b   :  { %v566_v20 = vpop.permute.xlu0 %565  ;;  %v564_v21 = vpop.permute.xlu1 %563  ;;  %v1362_v22 = vpack.c.bf16 %v596_v16, %v556_v11  ;;  %v702_v11 = vrot.slane %v1350_v62, %v1618_v9 }
 0x30c   :  { %v571_v24 = vsel %vm567_vm5, %v566_v20, %v560_v4  ;;  %v568_v25 = vsel %vm567_vm5, %v564_v21, %v566_v20  ;;  %v569_v26 = vsel %vm567_vm5, %v562_v2, %v564_v21 }
 0x30d   :  { %v595_v28 = vmul.f32 %v578_v8, %v571_v24  ;;  %v597_v29 = vmul.f32 %v586_v10, %v569_v26  ;;  %v598_v30 = vmul.f32 %v590_v17, %v568_v25  ;;  %1363 = vmatprep.subr.bf16.mxu0 %v1362_v22  ;;  %v710_v10 = vrot.slane %v1350_v62, %v1631_v15 }
 0x30f   :  { %v1364_v32 = vpack.c.bf16 %v595_v28, %v555_v19  ;;  %v1380_v33 = vpack.c.bf16 %v597_v29, %v557_v23  ;;  %v602_v35 = vpop.permute.xlu0 %601  ;;  %v600_v36 = vpop.permute.xlu1 %599  ;;  %v1378_v37 = vpack.c.bf16 %v598_v30, %v558_v27 }
 0x310   :  { %v610_v40 = vsel %vm607_vm6, %v600_v36, %v602_v35 }
 0x311   :  { %1365 = vmatpush1.bf16.msra.mxu0 %v1364_v32  ;;  %1379 = vmatprep.subr.bf16.mxu1 %v1378_v37  ;;  %v635_v45 = vmul.f32 %v618_v38, %v610_v40 }
 0x312   :  { %1381 = vmatpush1.bf16.msra.mxu1 %v1380_v33 }
 0x313   :  { %v606_v43 = vpop.permute.xlu0 %605  ;;  %v604_v44 = vpop.permute.xlu1 %603  ;;  %v1368_v59 = vpack.c.bf16 %v635_v45, %v1558_v57 }
 0x314   :  { %v611_v46 = vsel %vm607_vm6, %v606_v43, %v600_v36  ;;  %v608_v47 = vsel %vm607_vm6, %v604_v44, %v606_v43  ;;  %v609_v48 = vsel %vm607_vm6, %v602_v35, %v604_v44  ;;  %v1351_v35 = vld [vmem:[%s1946_s4 + $0x7] ss:$8 sm:$0xf] }
 0x315   :  { %v638_v49 = vmul.f32 %v630_v39, %v611_v46  ;;  %v636_v50 = vmul.f32 %v622_v41, %v609_v48  ;;  %v637_v51 = vmul.f32 %v626_v42, %v608_v47  ;;  %v750_v40 = vrot.slane %v1351_v35, %v1631_v15 }
 0x316   :  { %v742_v41 = vrot.slane %v1351_v35, %v1618_v9  ;;  %v746_v42 = vrot.slane %v1351_v35, %v1629_v14  ;;  %v738_v43 = vrot.slane %v1351_v35, %v1627_v12 }
 0x317   :  { %v1384_v52 = vpack.c.bf16 %v637_v51, %v1564_v63  ;;  %v642_v53 = vpop.permute.xlu0 %641  ;;  %v640_v54 = vpop.permute.xlu1 %639  ;;  %v1366_v55 = vpack.c.bf16 %v636_v50, %v1560_v58  ;;  %v1382_v56 = vpack.c.bf16 %v638_v49, %v1566_v0  ;;  %v1349_v63 = vld [vmem:[%s1946_s4 + $0x5] ss:$8 sm:$0xf] }
 0x318   :  { %v670_v57 = vrot.slane %v1349_v63, %v1631_v15  ;;  %v662_v58 = vrot.slane %v1349_v63, %v1618_v9  ;;  %v666_v4 = vrot.slane %v1349_v63, %v1629_v14  ;;  %v658_v16 = vrot.slane %v1349_v63, %v1627_v12  ;;  %v759_v9 = vld [vmem:[%s1944_s2] sm:$0xff]  ;;  %v1747_v12 = vpop.f32.mrb[2].mxu1  ;;  %v1749_v14 = vpop.f32.mrb[2].mxu0 }
 0x319   :  { %1367 = vmatprep.subr.bf16.mxu0 %v1366_v55  ;;  %1383 = vmatprep.subr.bf16.mxu1 %v1382_v56  ;;  %v650_v18 = vsel %vm647_vm8, %v640_v54, %v642_v53  ;;  %v1751_v15 = vpop.f32.mrb[3].mxu1  ;;  %v376_v55 = vmul.f32 %v1747_v12, %v1747_v12  ;;  %v306_v62 = vmul.f32 %v1749_v14, %v1749_v14 }
 0x31a   :  { %1369 = vmatpush1.bf16.msra.mxu0 %v1368_v59  ;;  %1385 = vmatpush1.bf16.msra.mxu1 %v1384_v52  ;;  %v675_v31 = vmul.f32 %v658_v16, %v650_v18  ;;  %v377_v56 = vmul.f32 %v1751_v15, %v1751_v15  ;;  %v1763_v59 = vpop.f32.mrb[4].mxu1 }
 0x31b   :  { %v646_v60 = vpop.permute.xlu0 %645  ;;  %v644_v61 = vpop.permute.xlu1 %643 }
 0x31c   :  { %v651_v2 = vsel %vm647_vm8, %v646_v60, %v640_v54  ;;  %v649_v5 = vsel %vm647_vm8, %v642_v53, %v644_v61  ;;  %v648_v17 = vsel %vm647_vm8, %v644_v61, %v646_v60  ;;  %v1753_v53 = vpop.f32.mrb[3].mxu0  ;;  %v1757_v54 = vadd.f32 %v1751_v15, %v1747_v12 }
 0x31d   :  { %v678_v19 = vmul.f32 %v670_v57, %v651_v2  ;;  %v676_v20 = vmul.f32 %v662_v58, %v649_v5  ;;  %v677_v27 = vmul.f32 %v666_v4, %v648_v17  ;;  %v1765_v60 = vpop.f32.mrb[4].mxu0  ;;  %v1769_v61 = vadd.f32 %v1753_v53, %v1749_v14  ;;  %v1777_v58 = vpop.f32.mrb[5].mxu1 }
 0x31e   :  { %v307_v63 = vmul.f32 %v1753_v53, %v1753_v53  ;;  %v1775_v57 = vadd.f32 %v377_v56, %v376_v55  ;;  %v1785_v2 = vadd.f32 %v1777_v58, %v1763_v59  ;;  %v378_v4 = vmul.f32 %v1763_v59, %v1763_v59 }
 0x31f   :  { %v682_v0 = vpop.permute.xlu0 %681  ;;  %v680_v1 = vpop.permute.xlu1 %679  ;;  %v379_v5 = vmul.f32 %v1777_v58, %v1777_v58 }
 0x320   :  { %v690_v8 = vsel %vm687_vm7, %v680_v1, %v682_v0 }
 0x321   :  { %v715_v23 = vmul.f32 %v698_v6, %v690_v8  ;;  %v308_v8 = vmul.f32 %v1765_v60, %v1765_v60 }
 0x323   :  { %v686_v21 = vpop.permute.xlu0 %685  ;;  %v684_v22 = vpop.permute.xlu1 %683  ;;  %v1372_v39 = vpack.c.bf16 %v715_v23, %v675_v31 }
 0x324   :  { %v691_v24 = vsel %vm687_vm7, %v686_v21, %v680_v1  ;;  %v688_v25 = vsel %vm687_vm7, %v684_v22, %v686_v21  ;;  %v689_v26 = vsel %vm687_vm7, %v682_v0, %v684_v22  ;;  %v1779_v0 = vpop.f32.mrb[5].mxu0  ;;  %v1781_v1 = vadd.f32 %v307_v63, %v306_v62 }
 0x325   :  { %v718_v28 = vmul.f32 %v710_v10, %v691_v24  ;;  %v716_v29 = vmul.f32 %v702_v11, %v689_v26  ;;  %v717_v30 = vmul.f32 %v706_v13, %v688_v25  ;;  %v301_v6 = vadd.f32 %v1779_v0, %v1765_v60 }
 0x326   :  { %v309_v10 = vmul.f32 %v1779_v0, %v1779_v0  ;;  %v383_v11 = vadd.f32 %v379_v5, %v378_v4 }
 0x327   :  { %v1388_v32 = vpack.c.bf16 %v717_v30, %v677_v27  ;;  %v722_v33 = vpop.permute.xlu0 %721  ;;  %v720_v36 = vpop.permute.xlu1 %719  ;;  %v1370_v37 = vpack.c.bf16 %v716_v29, %v676_v20  ;;  %v1386_v38 = vpack.c.bf16 %v718_v28, %v678_v19  ;;  %v1488_v28 = vmov 2  }
 0x328   :  { %v730_v44 = vsel %vm727_vm9, %v720_v36, %v722_v33  ;;  %v313_v13 = vadd.f32 %v309_v10, %v308_v8  ;;  %1413 = vset.pattern.permute.xlu1 %v1488_v28 }
 0x329   :  { %1371 = vmatprep.subr.bf16.mxu0 %v1370_v37  ;;  %1387 = vmatprep.subr.bf16.mxu1 %v1386_v38  ;;  %v755_v52 = vmul.f32 %v738_v43, %v730_v44  ;;  %v1489_v44 = vmov 3  }
 0x32a   :  { %1373 = vmatpush1.bf16.msra.mxu0 %v1372_v39  ;;  %1389 = vmatpush1.bf16.msra.mxu1 %v1388_v32 }
 0x32b   :  { %v726_v45 = vpop.permute.xlu0 %725  ;;  %v724_v46 = vpop.permute.xlu1 %723  ;;  %1415 = vset.pattern.permute.xlu0 %v1489_v44 }
 0x32c   :  { %v731_v47 = vsel %vm727_vm9, %v726_v45, %v720_v36  ;;  %v728_v48 = vsel %vm727_vm9, %v724_v46, %v726_v45  ;;  %v729_v49 = vsel %vm727_vm9, %v722_v33, %v724_v46 }
 0x32d   :  { %v758_v50 = vmul.f32 %v750_v40, %v731_v47  ;;  %v756_v7 = vmul.f32 %v742_v41, %v729_v49  ;;  %v757_v51 = vmul.f32 %v746_v42, %v728_v48 }
 0x32f   :  { %780 = vmatprep.subr.mxu0 %v756_v7  ;;  %851 = vmatprep.subr.mxu1 %v758_v50 }
 0x330   :  { %781 = vmatpush1.msra.mxu0 %v755_v52  ;;  %852 = vmatpush1.msra.mxu1 %v757_v51 }
 0x331   :  { %1353 = vmatmul.mubr.msk.f32.vlgmr.msra.gmra.mrb[6].mxu1 %vm760_vm10, %v759_v9  ;;  %1352 = vmatmul.mubr.msk.f32.vlgmr.msra.gmra.mrb[6].mxu0 %vm760_vm10, %v759_v9 }
 0x332   :  { %1057 = vmatprep.mubr.f32.mxu0 %v1477_v3  ;;  %1134 = vmatprep.mubr.f32.mxu1 %v1477_v3 }
 0x404   :  { %v1797_v16 = vpop.f32.mrb[6].mxu1  ;;  %v830_v17 = vpop.f32.mrb[6].mxu0 }
 0x405   :  { %v1799_v18 = vpop.f32.mrb[7].mxu1  ;;  %v832_v19 = vpop.f32.mrb[7].mxu0  ;;  %v910_v20 = vmul.f32 %v830_v17, %v830_v17  ;;  %v945_v21 = vmul.f32 %v1797_v16, %v1797_v16 }
 0x406   :  { %v941_v22 = vadd.f32 %v1799_v18, %v1797_v16  ;;  %v906_v23 = vadd.f32 %v832_v19, %v830_v17  ;;  %v911_v24 = vmul.f32 %v832_v19, %v832_v19  ;;  %v946_v25 = vmul.f32 %v1799_v18, %v1799_v18 }
 0x408   :  { %942 = vadd.xlane.f32.xlu0 %v941_v22  ;;  %907 = vadd.xlane.f32.xlu1 %v906_v23  ;;  %v912_v26 = vadd.f32 %v911_v24, %v910_v20  ;;  %v947_v27 = vadd.f32 %v946_v25, %v945_v21  ;;  %v1490_v22 = vmov 6  }
 0x40c   :  { %913 = vadd.xlane.f32.xlu0 %v912_v26 }
 0x410   :  { %948 = vadd.xlane.f32.xlu0 %v947_v27 }
 0x495   :  { %v943_v29 = vpop.xlane.xlu0 %942  ;;  %v908_v30 = vpop.xlane.xlu1 %907 }
 0x496   :  { %v909_v31 = vmul.f32 0.00390625, %v908_v30  ;;  %v944_v35 = vmul.f32 0.00390625, %v943_v29 }
 0x498   :  { %v916_v32 = vmul.f32 %v909_v31, %v909_v31  ;;  %v951_v39 = vmul.f32 %v944_v35, %v944_v35 }
 0x499   :  { %v914_v33 = vpop.xlane.xlu0 %913 }
 0x49a   :  { %v915_v36 = vmul.f32 0.00390625, %v914_v33 }
 0x49c   :  { %v917_v37 = vsub.f32 %v915_v36, %v916_v32 }
 0x49d   :  { %v949_v38 = vpop.xlane.xlu0 %948 }
 0x49e   :  { %v918_v40 = vadd.f32 1e-05, %v917_v37  ;;  %v950_v41 = vmul.f32 0.00390625, %v949_v38 }
 0x4a0   :  { %1432 = vrsqrt.f32 %v918_v40  ;;  %v952_v42 = vsub.f32 %v950_v41, %v951_v39 }
 0x4a2   :  { %v953_v43 = vadd.f32 1e-05, %v952_v42 }
 0x4a4   :  { %1434 = vrsqrt.f32 %v953_v43 }
 0x4aa   :  { %v1433_v45 = vpop.eup %1432 }
 0x4ab   :  { %v920_v46 = vmul.f32 %v1433_v45, %v1550_v34 }
 0x4ad   :  { %v921_v47 = vmul.f32 %v920_v46, %v909_v31 }
 0x4ae   :  { %v1435_v48 = vpop.eup %1434 }
 0x4af   :  { %923 = vrot.lane.b32.xlu1 %v921_v47, %s1480_s28  ;;  %v955_v49 = vmul.f32 %v1435_v48, %v1550_v34 }
 0x4b1   :  { %v956_v50 = vmul.f32 %v955_v49, %v944_v35 }
 0x4b3   :  { %958 = vrot.lane.b32.xlu0 %v956_v50, %s1480_s28  ;;  %929 = vperm.xlu1 %1413, %v920_v46  }
 0x4b7   :  { %964 = vperm.xlu1 %1413, %v955_v49  }
 0x4bb   :  { %1414 = vset.pattern.permute.xlu1 %v1489_v44 }
 0x521   :  { %v924_v7 = vpop.permute.xlu1 %923 }
 0x522   :  { %v926_v51 = vsub.f32 %v1550_v34, %v924_v7 }
 0x524   :  { %936 = vperm.xlu1 %1414, %v926_v51  }
 0x525   :  { %v959_v52 = vpop.permute.xlu0 %958 }
 0x526   :  { %v961_v9 = vsub.f32 %v1550_v34, %v959_v52 }
 0x528   :  { %971 = vperm.xlu0 %1415, %v961_v9   ;;  %1416 = vset.pattern.permute.xlu1 %v1490_v22 }
 0x532   :  { %v930_v55 = vpop.permute.xlu1 %929 }
 0x533   :  { %v932_v62 = vmul.f32 %v930_v55, %v830_v17  ;;  %v933_v63 = vmul.f32 %v930_v55, %v832_v19 }
 0x536   :  { %v965_v56 = vpop.permute.xlu1 %964 }
 0x547   :  { %302 = vadd.xlane.f32.xlu0 %v301_v6  ;;  %v967_v6 = vmul.f32 %v965_v56, %v1797_v16 }
 0x548   :  { %299 = vadd.xlane.f32.xlu1 %v1769_v61  ;;  %v968_v61 = vmul.f32 %v965_v56, %v1799_v18  ;;  %v985_v18 = vld [vmem:[%s1945_s3 + $0x8] sm:$0xff] }
 0x54b   :  { %311 = vadd.xlane.f32.xlu0 %v1781_v1 }
 0x54c   :  { %314 = vadd.xlane.f32.xlu1 %v313_v13 }
 0x54f   :  { %369 = vadd.xlane.f32.xlu0 %v1757_v54 }
 0x550   :  { %372 = vadd.xlane.f32.xlu1 %v1785_v2 }
 0x553   :  { %381 = vadd.xlane.f32.xlu0 %v1775_v57  ;;  %v984_v57 = vld [vmem:[%s1945_s3] sm:$0xff] }
 0x554   :  { %384 = vadd.xlane.f32.xlu1 %v383_v11 }
 0x5a3   :  { %v937_v4 = vpop.permute.xlu1 %936 }
 0x5a4   :  { %v939_v5 = vadd.f32 %v937_v4, %v932_v62  ;;  %v940_v8 = vadd.f32 %v937_v4, %v933_v63 }
 0x5a6   :  { %v976_v1 = vmul.f32 0.01, %v939_v5  ;;  %v977_v10 = vmul.f32 0.01, %v940_v8 }
 0x5a7   :  { %v972_v13 = vpop.permute.xlu0 %971 }
 0x5a8   :  { %v980_v54 = vmax.f32 %v939_v5, %v976_v1  ;;  %v981_v20 = vmax.f32 %v940_v8, %v977_v10  ;;  %v974_v2 = vadd.f32 %v972_v13, %v967_v6  ;;  %v975_v21 = vadd.f32 %v972_v13, %v968_v61  ;;  %v1872_v6 = vld [vmem:[%s1947_s5 + $0x8] sm:$0xff] }
 0x5aa   :  { %v978_v11 = vmul.f32 0.01, %v974_v2  ;;  %v979_v17 = vmul.f32 0.01, %v975_v21  ;;  %993 = vmatprep.subr.mxu0 %v981_v20  ;;  %v1491_v20 = vmov 7  }
 0x5ab   :  { %994 = vmatpush1.msra.mxu0 %v980_v54  ;;  %1417 = vset.pattern.permute.xlu0 %v1491_v20 }
 0x5ac   :  { %v982_v19 = vmax.f32 %v974_v2, %v978_v11  ;;  %v983_v16 = vmax.f32 %v975_v21, %v979_v17  ;;  %1354 = vmatmul.mubr.msk.f32.vlgmr.msra.gmra.mrb[8].mxu0 %vm986_vm11, %v984_v57 }
 0x5ad   :  { %1063 = vmatprep.mubr.f32.mxu0 %v1477_v3 }
 0x5ae   :  { %1070 = vmatprep.subr.mxu1 %v983_v16 }
 0x5af   :  { %1071 = vmatpush1.msra.mxu1 %v982_v19 }
 0x5b0   :  { %1355 = vmatmul.mubr.msk.f32.gmra.mrb[10].mxu0 %vm986_vm11, %v985_v18  ;;  %1356 = vmatmul.mubr.msk.f32.vlgmr.msra.gmra.mrb[8].mxu1 %vm986_vm11, %v984_v57 }
 0x5b1   :  { %1140 = vmatprep.mubr.f32.mxu1 %v1477_v3 }
 0x5b4   :  { %1357 = vmatmul.mubr.msk.f32.gmra.mrb[10].mxu1 %vm986_vm11, %v985_v18 }
 0x5d4   :  { %v303_v24 = vpop.xlane.xlu0 %302 }
 0x5d5   :  { %v300_v23 = vpop.xlane.xlu1 %299  ;;  %v305_v32 = vmul.f32 0.00390625, %v303_v24 }
 0x5d6   :  { %v304_v30 = vmul.f32 0.00390625, %v300_v23 }
 0x5d7   :  { %v319_v48 = vmul.f32 %v305_v32, %v305_v32 }
 0x5d8   :  { %v312_v31 = vpop.xlane.xlu0 %311  ;;  %v318_v46 = vmul.f32 %v304_v30, %v304_v30 }
 0x5d9   :  { %v315_v28 = vpop.xlane.xlu1 %314  ;;  %v316_v47 = vmul.f32 0.00390625, %v312_v31 }
 0x5da   :  { %v317_v37 = vmul.f32 0.00390625, %v315_v28 }
 0x5db   :  { %v320_v62 = vsub.f32 %v316_v47, %v318_v46 }
 0x5dc   :  { %v321_v9 = vsub.f32 %v317_v37, %v319_v48  ;;  %v370_v21 = vpop.xlane.xlu0 %369 }
 0x5dd   :  { %v322_v5 = vadd.f32 1e-05, %v320_v62  ;;  %v373_v2 = vpop.xlane.xlu1 %372  ;;  %v374_v18 = vmul.f32 0.00390625, %v370_v21 }
 0x5de   :  { %v323_v4 = vadd.f32 1e-05, %v321_v9  ;;  %v375_v11 = vmul.f32 0.00390625, %v373_v2 }
 0x5e0   :  { %1436 = vrsqrt.f32 %v323_v4  ;;  %v389_v19 = vmul.f32 %v375_v11, %v375_v11  ;;  %v382_v16 = vpop.xlane.xlu0 %381 }
 0x5e1   :  { %1438 = vrsqrt.f32 %v322_v5  ;;  %v385_v57 = vpop.xlane.xlu1 %384  ;;  %v386_v24 = vmul.f32 0.00390625, %v382_v16 }
 0x5e2   :  { %v387_v17 = vmul.f32 0.00390625, %v385_v57 }
 0x5e4   :  { %v391_v23 = vsub.f32 %v387_v17, %v389_v19 }
 0x5e6   :  { %v393_v28 = vadd.f32 1e-05, %v391_v23  ;;  %v1886_v23 = vld [vmem:[%s1947_s5] sm:$0xff]  ;;  %s1494_s5 = smov [#allocation2]  }
 0x5e8   :  { %1440 = vrsqrt.f32 %v393_v28 }
 0x5ea   :  { %v1437_v8 = vpop.eup %1436 }
 0x5eb   :  { %v1439_v61 = vpop.eup %1438  ;;  %v327_v1 = vmul.f32 %v1437_v8, %v1872_v6 }
 0x5ec   :  { %v326_v10 = vmul.f32 %v1439_v61, %v1550_v34 }
 0x5ed   :  { %v329_v13 = vmul.f32 %v327_v1, %v305_v32 }
 0x5ee   :  { %v328_v54 = vmul.f32 %v326_v10, %v304_v30 }
 0x67f   :  { %v1829_v25 = vpop.f32.mrb[8].mxu0 }
 0x680   :  { %v1831_v26 = vpop.f32.mrb[9].mxu0  ;;  %v1155_v27 = vmul.f32 %v1829_v25, %v1829_v25 }
 0x681   :  { %v1147_v29 = vadd.f32 %v1831_v26, %v1829_v25  ;;  %v1156_v3 = vmul.f32 %v1831_v26, %v1831_v26 }
 0x683   :  { %v1839_v33 = vpop.f32.mrb[10].mxu0  ;;  %v1841_v35 = vpop.f32.mrb[8].mxu1  ;;  %1148 = vadd.xlane.f32.xlu0 %v1147_v29  ;;  %v1159_v36 = vadd.f32 %v1156_v3, %v1155_v27  ;;  %v388_v27 = vmul.f32 %v374_v18, %v374_v18 }
 0x684   :  { %v1843_v38 = vpop.f32.mrb[11].mxu0  ;;  %v1845_v39 = vpop.f32.mrb[9].mxu1  ;;  %v1157_v40 = vmul.f32 %v1839_v33, %v1839_v33  ;;  %v1225_v41 = vmul.f32 %v1841_v35, %v1841_v35 }
 0x685   :  { %v1158_v42 = vmul.f32 %v1843_v38, %v1843_v38  ;;  %v1150_v43 = vadd.f32 %v1843_v38, %v1839_v33  ;;  %v1217_v44 = vadd.f32 %v1845_v39, %v1841_v35  ;;  %v1226_v45 = vmul.f32 %v1845_v39, %v1845_v39 }
 0x686   :  { %v390_v29 = vsub.f32 %v386_v24, %v388_v27 }
 0x687   :  { %v1859_v49 = vpop.f32.mrb[10].mxu1  ;;  %1151 = vadd.xlane.f32.xlu1 %v1150_v43  ;;  %1218 = vadd.xlane.f32.xlu0 %v1217_v44  ;;  %v1162_v50 = vadd.f32 %v1158_v42, %v1157_v40  ;;  %v1229_v7 = vadd.f32 %v1226_v45, %v1225_v41 }
 0x688   :  { %v1861_v51 = vpop.f32.mrb[11].mxu1  ;;  %v1227_v52 = vmul.f32 %v1859_v49, %v1859_v49  ;;  %v392_v30 = vadd.f32 1e-05, %v390_v29 }
 0x689   :  { %v1228_v55 = vmul.f32 %v1861_v51, %v1861_v51  ;;  %v1220_v56 = vadd.f32 %v1861_v51, %v1859_v49 }
 0x68a   :  { %1442 = vrsqrt.f32 %v392_v30 }
 0x68b   :  { %1221 = vadd.xlane.f32.xlu1 %v1220_v56  ;;  %1160 = vadd.xlane.f32.xlu0 %v1159_v36  ;;  %v1232_v63 = vadd.f32 %v1228_v55, %v1227_v52 }
 0x68f   :  { %1163 = vadd.xlane.f32.xlu1 %v1162_v50  ;;  %1230 = vadd.xlane.f32.xlu0 %v1229_v7  ;;  %v1441_v7 = vpop.eup %1440 }
 0x690   :  { %v397_v61 = vmul.f32 %v1441_v7, %v1872_v6 }
 0x692   :  { %v399_v16 = vmul.f32 %v397_v61, %v375_v11 }
 0x693   :  { %1233 = vadd.xlane.f32.xlu1 %v1232_v63 }
 0x694   :  { %v1443_v2 = vpop.eup %1442 }
 0x695   :  { %v396_v24 = vmul.f32 %v1886_v23, %v1443_v2 }
 0x697   :  { %v398_v11 = vmul.f32 %v396_v24, %v374_v18 }
 0x6a4   :  { %334 = vrot.lane.b32.xlu1 %v329_v13, %s1480_s28 }
 0x6a5   :  { %332 = vrot.lane.b32.xlu0 %v328_v54, %s1480_s28 }
 0x6a8   :  { %342 = vperm.xlu1 %1416, %v326_v10  }
 0x6ac   :  { %347 = vperm.xlu1 %1416, %v327_v1  }
 0x6b0   :  { %1418 = vset.pattern.permute.xlu1 %v1491_v20 }
 0x710   :  { %v1149_v3 = vpop.xlane.xlu0 %1148 }
 0x711   :  { %v1153_v36 = vmul.f32 0.00390625, %v1149_v3 }
 0x713   :  { %v1167_v42 = vmul.f32 %v1153_v36, %v1153_v36 }
 0x714   :  { %v1152_v31 = vpop.xlane.xlu1 %1151  ;;  %v1219_v32 = vpop.xlane.xlu0 %1218 }
 0x715   :  { %v1154_v37 = vmul.f32 0.00390625, %v1152_v31  ;;  %v1223_v43 = vmul.f32 0.00390625, %v1219_v32 }
 0x717   :  { %v1168_v46 = vmul.f32 %v1154_v37, %v1154_v37  ;;  %v1237_v52 = vmul.f32 %v1223_v43, %v1223_v43 }
 0x718   :  { %v1222_v40 = vpop.xlane.xlu1 %1221  ;;  %v1161_v41 = vpop.xlane.xlu0 %1160 }
 0x719   :  { %v1165_v44 = vmul.f32 0.00390625, %v1161_v41  ;;  %v1224_v47 = vmul.f32 0.00390625, %v1222_v40  ;;  %v1492_v41 = vmov 4  }
 0x71b   :  { %v1169_v45 = vsub.f32 %v1165_v44, %v1167_v42  ;;  %v1238_v4 = vmul.f32 %v1224_v47, %v1224_v47 }
 0x71c   :  { %v1164_v48 = vpop.xlane.xlu1 %1163  ;;  %v1231_v50 = vpop.xlane.xlu0 %1230 }
 0x71d   :  { %v1171_v9 = vadd.f32 1e-05, %v1169_v45  ;;  %v1166_v55 = vmul.f32 0.00390625, %v1164_v48  ;;  %v1235_v56 = vmul.f32 0.00390625, %v1231_v50 }
 0x71f   :  { %1444 = vrsqrt.f32 %v1171_v9  ;;  %v1170_v62 = vsub.f32 %v1166_v55, %v1168_v46  ;;  %v1239_v63 = vsub.f32 %v1235_v56, %v1237_v52 }
 0x720   :  { %v1234_v5 = vpop.xlane.xlu1 %1233  ;;  %v333_v8 = vpop.permute.xlu0 %332 }
 0x721   :  { %v1172_v1 = vadd.f32 1e-05, %v1170_v62  ;;  %v1241_v10 = vadd.f32 1e-05, %v1239_v63  ;;  %v1236_v13 = vmul.f32 0.00390625, %v1234_v5  ;;  %v338_v54 = vsub.f32 %v1550_v34, %v333_v8 }
 0x723   :  { %1446 = vrsqrt.f32 %v1172_v1  ;;  %v1240_v21 = vsub.f32 %v1236_v13, %v1238_v4  ;;  %356 = vperm.xlu0 %1417, %v338_v54  }
 0x724   :  { %1448 = vrsqrt.f32 %v1241_v10  ;;  %v335_v57 = vpop.permute.xlu1 %334 }
 0x725   :  { %v1242_v17 = vadd.f32 1e-05, %v1240_v21  ;;  %v339_v19 = vsub.f32 %v1872_v6, %v335_v57 }
 0x727   :  { %1450 = vrsqrt.f32 %v1242_v17  ;;  %361 = vperm.xlu1 %1418, %v339_v19   ;;  %404 = vrot.lane.b32.xlu0 %v399_v16, %s1480_s28 }
 0x728   :  { %v343_v34 = vpop.permute.xlu1 %342  ;;  %1420 = vset.pattern.permute.xlu0 %v1490_v22 }
 0x729   :  { %v1445_v27 = vpop.eup %1444  ;;  %v350_v28 = vmul.f32 %v343_v34, %v1749_v14  ;;  %v351_v29 = vmul.f32 %v343_v34, %v1753_v53 }
 0x72a   :  { %v1175_v3 = vmul.f32 %v1886_v23, %v1445_v27 }
 0x72b   :  { %402 = vrot.lane.b32.xlu1 %v398_v11, %s1480_s28  ;;  %417 = vperm.xlu0 %1420, %v397_v61  }
 0x72c   :  { %1419 = vset.pattern.permute.xlu1 %v1490_v22  ;;  %v1177_v30 = vmul.f32 %v1175_v3, %v1153_v36  ;;  %v1493_v36 = vmov 5   ;;  %v348_v45 = vpop.permute.xlu1 %347 }
 0x72d   :  { %v1447_v31 = vpop.eup %1446  ;;  %v352_v7 = vmul.f32 %v348_v45, %v1765_v60  ;;  %v353_v52 = vmul.f32 %v348_v45, %v1779_v0 }
 0x72e   :  { %v1449_v32 = vpop.eup %1448  ;;  %v1176_v40 = vmul.f32 %v1447_v31, %v1872_v6 }
 0x72f   :  { %412 = vperm.xlu1 %1419, %v396_v24   ;;  %1181 = vrot.lane.b32.xlu0 %v1177_v30, %s1480_s28  ;;  %v1245_v14 = vmul.f32 %v1886_v23, %v1449_v32 }
 0x730   :  { %1422 = vset.pattern.permute.xlu0 %v1492_v41  ;;  %v1178_v53 = vmul.f32 %v1176_v40, %v1154_v37 }
 0x731   :  { %v1451_v18 = vpop.eup %1450  ;;  %v1247_v42 = vmul.f32 %v1245_v14, %v1223_v43 }
 0x732   :  { %v1246_v44 = vmul.f32 %v1451_v18, %v1872_v6 }
 0x733   :  { %1191 = vperm.xlu0 %1422, %v1175_v3   ;;  %1421 = vset.pattern.permute.xlu1 %v1491_v20 }
 0x734   :  { %v1248_v22 = vmul.f32 %v1246_v44, %v1224_v47 }
 0x737   :  { %1261 = vperm.xlu0 %1422, %v1245_v14  }
 0x73b   :  { %1425 = vset.pattern.permute.xlu0 %v1493_v36 }
 0x7a2   :  { %v357_v46 = vpop.permute.xlu0 %356 }
 0x7a3   :  { %v364_v48 = vadd.f32 %v357_v46, %v350_v28  ;;  %v365_v50 = vadd.f32 %v357_v46, %v351_v29 }
 0x7a6   :  { %v362_v37 = vpop.permute.xlu1 %361  ;;  %v405_v9 = vpop.permute.xlu0 %404 }
 0x7a7   :  { %v1903_v43 = vadd.f32 %v362_v37, %v352_v7  ;;  %v1905_v55 = vadd.f32 %v362_v37, %v353_v52  ;;  %v409_v4 = vsub.f32 %v1872_v6, %v405_v9 }
 0x7aa   :  { %v403_v56 = vpop.permute.xlu1 %402  ;;  %v418_v20 = vpop.permute.xlu0 %417 }
 0x7ab   :  { %v408_v47 = vsub.f32 %v1886_v23, %v403_v56  ;;  %v422_v62 = vmul.f32 %v418_v20, %v1763_v59  ;;  %v423_v63 = vmul.f32 %v418_v20, %v1777_v58 }
 0x7ad   :  { %426 = vperm.xlu1 %1421, %v408_v47  }
 0x7ae   :  { %v1182_v60 = vpop.permute.xlu0 %1181  ;;  %v413_v59 = vpop.permute.xlu1 %412 }
 0x7af   :  { %v1187_v0 = vsub.f32 %v1886_v23, %v1182_v60  ;;  %v420_v58 = vmul.f32 %v413_v59, %v1747_v12  ;;  %v421_v5 = vmul.f32 %v413_v59, %v1751_v15 }
 0x7b1   :  { %431 = vperm.xlu1 %1421, %v409_v4  }
 0x7b2   :  { %v1192_v27 = vpop.permute.xlu0 %1191 }
 0x7b3   :  { %v1199_v29 = vmul.f32 %v1192_v27, %v1829_v25 }
 0x7b5   :  { %1251 = vrot.lane.b32.xlu1 %v1247_v42, %s1480_s28 }
 0x7b6   :  { %1423 = vset.pattern.permute.xlu1 %v1492_v41  ;;  %v1262_v41 = vpop.permute.xlu0 %1261 }
 0x7b9   :  { %1196 = vperm.xlu1 %1423, %v1176_v40  }
 0x7bd   :  { %1183 = vrot.lane.b32.xlu1 %v1178_v53, %s1480_s28 }
 0x7c1   :  { %1253 = vrot.lane.b32.xlu1 %v1248_v22, %s1480_s28  ;;  %s1324_s28 = sshll.u32 %s1494_s5, 4  ;;  %s1325_s28 = int_to_ptr.vmem [resolvable:$true] %s1324_s28 }
 0x7c2   :  { %s1453_s14 = scalar_lea.vmem %s1325_s28, 1024  ;;  %p1458_p1 = scmp.lt.s32.totalorder %s1325_s28, %s1325_s28 }
 0x7c3   :  { %p1454_p0 = scmp.ne.s32.totalorder %s1325_s28, %s1453_s14  ;;  %p1459_p2 = scmp.lt.s32.totalorder %s1453_s14, %s1453_s14 }
 0x7c5   :  { %1266 = vperm.xlu1 %1423, %v1246_v44   ;;  %p1460_p3 = por %p1459_p2, %p1458_p1 }
 0x7c7   :  { %p1461_p4 = pnand %p1460_p3, %p1454_p0 }
 0x7c9   :  { %1424 = vset.pattern.permute.xlu1 %v1493_v36 }
 0x7ca   :  { %1205 = vperm.xlu1 %1424, %v1187_v0  }
 0x82c   :  { %v427_v8 = vpop.permute.xlu1 %426 }
 0x82d   :  { %v434_v61 = vadd.f32 %v427_v8, %v420_v58  ;;  %v435_v1 = vadd.f32 %v427_v8, %v421_v5 }
 0x830   :  { %v432_v10 = vpop.permute.xlu1 %431 }
 0x831   :  { %v436_v13 = vadd.f32 %v432_v10, %v422_v62  ;;  %v437_v54 = vadd.f32 %v432_v10, %v423_v63 }
 0x834   :  { %v1252_v2 = vpop.permute.xlu1 %1251 }
 0x835   :  { %v1257_v21 = vsub.f32 %v1886_v23, %v1252_v2 }
 0x837   :  { %1275 = vperm.xlu1 %1424, %v1257_v21  }
 0x838   :  { %v1197_v57 = vpop.permute.xlu1 %1196 }
 0x839   :  { %v1201_v17 = vmul.f32 %v1197_v57, %v1839_v33  ;;  %v1202_v19 = vmul.f32 %v1197_v57, %v1843_v38  ;;  %v1200_v33 = vmul.f32 %v1192_v27, %v1831_v26 }
 0x83c   :  { %v1184_v16 = vpop.permute.xlu1 %1183 }
 0x83d   :  { %v1188_v12 = vsub.f32 %v1872_v6, %v1184_v16 }
 0x83f   :  { %1210 = vperm.xlu0 %1425, %v1188_v12  }
 0x840   :  { %v1254_v15 = vpop.permute.xlu1 %1253 }
 0x841   :  { %v1258_v24 = vsub.f32 %v1872_v6, %v1254_v15 }
 0x843   :  { %1280 = vperm.xlu0 %1425, %v1258_v24  }
 0x844   :  { %v1267_v34 = vpop.permute.xlu1 %1266 }
 0x845   :  { %v1271_v28 = vmul.f32 %v1267_v34, %v1859_v49  ;;  %v1272_v23 = vmul.f32 %v1267_v34, %v1861_v51  ;;  %v1269_v49 = vmul.f32 %v1262_v41, %v1841_v35  ;;  %v1270_v51 = vmul.f32 %v1262_v41, %v1845_v39 }
 0x849   :  { %v1206_v11 = vpop.permute.xlu1 %1205 }
 0x84a   :  { %v1213_v38 = vadd.f32 %v1206_v11, %v1199_v29  ;;  %v1214_v3 = vadd.f32 %v1206_v11, %v1200_v33 }
 0x84c   :  { %v1287_v30 = vadd.f32 %v1213_v38, %v364_v48  ;;  %v1288_v31 = vadd.f32 %v1214_v3, %v365_v50 }
 0x84e   :  { %v1295_v32 = vmul.f32 0.01, %v1287_v30  ;;  %v1296_v40 = vmul.f32 0.01, %v1288_v31 }
 0x850   :  { %v1303_v14 = vmax.f32 %v1287_v30, %v1295_v32  ;;  %v1304_v6 = vmax.f32 %v1288_v31, %v1296_v40 }
 0x852   :  { %1311 = vst [vmem:[#allocation2] sm:$0xff] %v1303_v14  ;;  %1312 = vst [vmem:[#allocation2 + $0x8] sm:$0xff] %v1304_v6 }
 0x8b6   :  { %v1276_v53 = vpop.permute.xlu1 %1275 }
 0x8b7   :  { %v1283_v25 = vadd.f32 %v1276_v53, %v1269_v49  ;;  %v1284_v18 = vadd.f32 %v1276_v53, %v1270_v51 }
 0x8b9   :  { %v1289_v26 = vadd.f32 %v1283_v25, %v434_v61  ;;  %v1290_v42 = vadd.f32 %v1284_v18, %v435_v1 }
 0x8bb   :  { %v1297_v44 = vmul.f32 0.01, %v1289_v26  ;;  %v1298_v22 = vmul.f32 0.01, %v1290_v42 }
 0x8bd   :  { %v1305_v36 = vmax.f32 %v1289_v26, %v1297_v44  ;;  %v1306_v45 = vmax.f32 %v1290_v42, %v1298_v22 }
 0x8be   :  { %v1211_v46 = vpop.permute.xlu0 %1210 }
 0x8bf   :  { %1313 = vst [vmem:[#allocation2 + $0x10] sm:$0xff] %v1305_v36  ;;  %1314 = vst [vmem:[#allocation2 + $0x18] sm:$0xff] %v1306_v45  ;;  %v1215_v48 = vadd.f32 %v1211_v46, %v1201_v17  ;;  %v1216_v50 = vadd.f32 %v1211_v46, %v1202_v19 }
 0x8c1   :  { %v1291_v7 = vadd.f32 %v1215_v48, %v1903_v43  ;;  %v1292_v35 = vadd.f32 %v1216_v50, %v1905_v55 }
 0x8c2   :  { %v1281_v52 = vpop.permute.xlu0 %1280 }
 0x8c3   :  { %v1299_v39 = vmul.f32 0.01, %v1291_v7  ;;  %v1300_v37 = vmul.f32 0.01, %v1292_v35  ;;  %v1285_v9 = vadd.f32 %v1281_v52, %v1271_v28  ;;  %v1286_v56 = vadd.f32 %v1281_v52, %v1272_v23 }
 0x8c5   :  { %v1307_v20 = vmax.f32 %v1291_v7, %v1299_v39  ;;  %v1308_v47 = vmax.f32 %v1292_v35, %v1300_v37  ;;  %v1293_v62 = vadd.f32 %v1285_v9, %v436_v13  ;;  %v1294_v63 = vadd.f32 %v1286_v56, %v437_v54 }
 0x8c7   :  { %1315 = vst [vmem:[#allocation2 + $0x20] sm:$0xff] %v1307_v20  ;;  %1316 = vst [vmem:[#allocation2 + $0x28] sm:$0xff] %v1308_v47  ;;  %v1301_v4 = vmul.f32 0.01, %v1293_v62  ;;  %v1302_v60 = vmul.f32 0.01, %v1294_v63 }
 0x8c9   :  { %v1309_v0 = vmax.f32 %v1293_v62, %v1301_v4  ;;  %v1310_v59 = vmax.f32 %v1294_v63, %v1302_v60 }
 0x8cb   :  { %1317 = vst [vmem:[#allocation2 + $0x30] sm:$0xff] %v1309_v0  ;;  %1318 = vst [vmem:[#allocation2 + $0x38] sm:$0xff] %v1310_v59 }
 0x8cc   :  { %1464 = shalt.err (!%p1461_p4)
}
 0x8cd   :  { %s1465_s16 = scalar_lea.hbm %s1948_s6, 1024 }
 0x8ce   :  { %p1466_p5 = scmp.ne.s32.totalorder %s1948_s6, %s1465_s16  ;;  %p1469_p6 = scmp.lt.u32.totalorder %s1465_s16, %s1948_s6 }
 0x8d0   :  { %p1471_p7 = pnand %p1469_p6, %p1466_p5 }
 0x8d2   :  { %1474 = shalt.err (!%p1471_p7)
}
 0x8d3   :  { %s1495_s21 = smov 512   ;;  %s1496_s22 = smov 32  }
 0x8d4   :  { %1330 = dma.vmem_to_hbm [thread:$0]  %s1325_s28, 1024, %s1948_s6, [#allocation3], %s1495_s21, %s1495_s21, %s1496_s22  }
 0x8d5   :  { %1475 = dma.done.wait [#allocation3], 1024  }
 0x8d6   :  { %1476 = vsyncadd [#allocation3], 4294966272 }
 0x8d7   :  { %1334 = vsyncpa [#allocation3], 1 }

</bundles_post_ra>
